<compile_context>
chip_gen: v5e
topology: v5e:2x2
jax: 0.10.0
libtpu: 0.0.40
codegen_flags: <defaults>
</compile_context>

<pallas_src>
import jax
import jax.numpy as jnp
from jax.experimental import pallas as pl
from jax.experimental.pallas import tpu as pltpu


NUM_LAYERS = 2
DIM_FEEDFORWARD = 2048  # nn.TransformerEncoderLayer default
LN_EPS = 1e-5           # nn.LayerNorm default


def _layernorm(h, w, b, eps=LN_EPS):
    mu = jnp.mean(h, axis=-1, keepdims=True)
    var = jnp.mean((h - mu) ** 2, axis=-1, keepdims=True)
    return (h - mu) * jax.lax.rsqrt(var + eps) * w + b


def _transformer_salary_kernel(
    x_ref,
    wvo_ref, bvo_ref,
    ln1w_ref, ln1b_ref, ln2w_ref, ln2b_ref,
    w1_ref, b1_ref, w2_ref, b2_ref,
    fc1w_ref, fc1b_ref, fc2w_ref, fc2b_ref,
    out_ref,
):
    x = x_ref[...].astype(jnp.float32)                      # (Bb, E)
    num_layers = wvo_ref.shape[0]
    for l in range(num_layers):                             # static unroll over encoder layers
        # --- self-attention block: seq_len == 1 => softmax == 1, Wv/Wo pre-fused ---
        attn = jnp.dot(x, wvo_ref[l], preferred_element_type=jnp.float32) + bvo_ref[l]
        h = _layernorm(x + attn, ln1w_ref[l], ln1b_ref[l])
        # --- feed-forward block: bf16 MXU operands, f32 accumulation ---
        ff = jnp.dot(h.astype(jnp.bfloat16), w1_ref[l],
                     preferred_element_type=jnp.float32) + b1_ref[l]
        ff = jnp.maximum(ff, 0.0)
        ff = jnp.dot(ff.astype(jnp.bfloat16), w2_ref[l],
                     preferred_element_type=jnp.float32) + b2_ref[l]
        x = _layernorm(h + ff, ln2w_ref[l], ln2b_ref[l])
    # --- prediction head: fc1 -> relu -> fc2 (tiny; kept f32) ---
    y = jnp.maximum(
        jnp.dot(x, fc1w_ref[...], preferred_element_type=jnp.float32) + fc1b_ref[...], 0.0)
    out = jnp.dot(y, fc2w_ref[...], preferred_element_type=jnp.float32) + fc2b_ref[...]
    out_ref[...] = out.astype(out_ref.dtype)


def transformer_salary_predict(x, packed, *, batch_block=256):
    """Whole forward pass in one Pallas call; batch optionally tiled across a parallel grid."""
    B, E = x.shape
    O = packed["fc2_w"].shape[1]
    # Either take the whole batch in one block, or tile with a sublane-aligned block.
    if B <= batch_block:
        bb = B
    else:
        bb = (batch_block // 8) * 8
    grid = (pl.cdiv(B, bb),)

    def full_spec(arr):
        # Constant index_map -> block never changes -> weights stay VMEM-resident
        # across batch-tile iterations (no re-DMA).
        return pl.BlockSpec(arr.shape, lambda i, nd=arr.ndim: (0,) * nd)

    weight_args = (
        packed["wvo"], packed["bvo"],
        packed["ln1_w"], packed["ln1_b"], packed["ln2_w"], packed["ln2_b"],
        packed["w1"], packed["b1"], packed["w2"], packed["b2"],
        packed["fc1_w"], packed["fc1_b"], packed["fc2_w"], packed["fc2_b"],
    )
    in_specs = [pl.BlockSpec((bb, E), lambda i: (i, 0))] + [full_spec(a) for a in weight_args]

    return pl.pallas_call(
        _transformer_salary_kernel,
        out_shape=jax.ShapeDtypeStruct((B, O), jnp.float32),
        grid=grid,
        in_specs=in_specs,
        out_specs=pl.BlockSpec((bb, O), lambda i: (i, 0)),
        compiler_params=pltpu.CompilerParams(dimension_semantics=("parallel",)),
    )(x, *weight_args)


# ----------------------------------------------------------------------------
# Deterministic synthetic parameters (PyTorch-shaped), then packed for kernel.
# ----------------------------------------------------------------------------
def init_raw_params(key, input_size, output_size,
                    num_layers=NUM_LAYERS, dim_feedforward=DIM_FEEDFORWARD):
    E, O, FF = input_size, output_size, dim_feedforward

    def nrm(k, shape, scale=0.05):
        return (scale * jax.random.normal(k, shape)).astype(jnp.float32)

    keys = jax.random.split(key, 8 * num_layers + 4)
    layers = []
    for l in range(num_layers):
        k = keys[8 * l: 8 * (l + 1)]
        layers.append(dict(
            in_proj_w=nrm(k[0], (3 * E, E)),        # MultiheadAttention in_proj_weight
            in_proj_b=nrm(k[1], (3 * E,)),
            out_proj_w=nrm(k[2], (E, E)),
            out_proj_b=nrm(k[3], (E,)),
            ln1_w=jnp.ones((E,), jnp.float32),
            ln1_b=jnp.zeros((E,), jnp.float32),
            ln2_w=jnp.ones((E,), jnp.float32),
            ln2_b=jnp.zeros((E,), jnp.float32),
            w1=nrm(k[4], (FF, E)),                  # linear1.weight
            b1=nrm(k[5], (FF,)),
            w2=nrm(k[6], (E, FF)),                  # linear2.weight
            b2=nrm(k[7], (E,)),
        ))
    kf = keys[8 * num_layers:]
    return dict(
        layers=layers,
        fc1_w=nrm(kf[0], (2 * O, E)),
        fc1_b=nrm(kf[1], (2 * O,)),
        fc2_w=nrm(kf[2], (O, 2 * O)),
        fc2_b=nrm(kf[3], (O,)),
    )


def pack_params(raw):
    E = raw["layers"][0]["out_proj_w"].shape[0]

    def stack(fn):
        return jnp.stack([fn(lyr) for lyr in raw["layers"]])

    def fused_wvo(l):
        # (x @ Wv^T + bv) @ Wo^T + bo == x @ (Wv^T @ Wo^T) + (bv @ Wo^T + bo)
        return l["in_proj_w"][2 * E:3 * E].T @ l["out_proj_w"].T            # (E, E)

    def fused_bvo(l):
        return (l["in_proj_b"][2 * E:3 * E] @ l["out_proj_w"].T
                + l["out_proj_b"])[None, :]                                  # (1, E)

    return dict(
        wvo=stack(fused_wvo),                                      # (L, E, E)  f32
        bvo=stack(fused_bvo),                                      # (L, 1, E)  f32
        ln1_w=stack(lambda l: l["ln1_w"][None, :]),
        ln1_b=stack(lambda l: l["ln1_b"][None, :]),
        ln2_w=stack(lambda l: l["ln2_w"][None, :]),
        ln2_b=stack(lambda l: l["ln2_b"][None, :]),
        w1=stack(lambda l: l["w1"].T.astype(jnp.bfloat16)),        # (L, E, FF) bf16
        b1=stack(lambda l: l["b1"][None, :]),                      # (L, 1, FF) f32
        w2=stack(lambda l: l["w2"].T.astype(jnp.bfloat16)),        # (L, FF, E) bf16
        b2=stack(lambda l: l["b2"][None, :]),                      # (L, 1, E)  f32
        fc1_w=raw["fc1_w"].T,                                      # (E, 2O)
        fc1_b=raw["fc1_b"][None, :],
        fc2_w=raw["fc2_w"].T,                                      # (2O, O)
        fc2_b=raw["fc2_b"][None, :],
    )


# ----------------------------------------------------------------------------
# Pure-JAX reference (mirrors PyTorch eval-mode forward, full f32, unfused).
# ----------------------------------------------------------------------------
def reference_forward(x, raw):
    E = x.shape[-1]
    h = x
    for lyr in raw["layers"]:
        q = h @ lyr["in_proj_w"][0:E].T + lyr["in_proj_b"][0:E]
        k = h @ lyr["in_proj_w"][E:2 * E].T + lyr["in_proj_b"][E:2 * E]
        v = h @ lyr["in_proj_w"][2 * E:3 * E].T + lyr["in_proj_b"][2 * E:3 * E]
        scores = jnp.sum(q * k, axis=-1, keepdims=True) / jnp.sqrt(jnp.float32(E))
        attn_w = jnp.exp(scores - scores)  # softmax over single key == 1.0
        attn = (attn_w * v) @ lyr["out_proj_w"].T + lyr["out_proj_b"]
        h1 = _layernorm(h + attn, lyr["ln1_w"], lyr["ln1_b"])
        ff = jnp.maximum(h1 @ lyr["w1"].T + lyr["b1"], 0.0) @ lyr["w2"].T + lyr["b2"]
        h = _layernorm(h1 + ff, lyr["ln2_w"], lyr["ln2_b"])
    y = jnp.maximum(h @ raw["fc1_w"].T + raw["fc1_b"], 0.0)
    return y @ raw["fc2_w"].T + raw["fc2_b"]


if __name__ == "__main__":
    BATCH = 8
    INPUT_SIZE = 32     # d_model
    OUTPUT_SIZE = 8

    key = jax.random.PRNGKey(0)
    k_x, k_p = jax.random.split(key)
    x = jax.random.normal(k_x, (BATCH, INPUT_SIZE), dtype=jnp.float32)

    raw = init_raw_params(k_p, INPUT_SIZE, OUTPUT_SIZE)
    packed = pack_params(raw)

    out = transformer_salary_predict(x, packed)
    out = jax.block_until_ready(out)

    ref = jax.block_until_ready(reference_forward(x, raw))
    assert out.shape == (BATCH, OUTPUT_SIZE), out.shape
    max_diff = float(jnp.max(jnp.abs(out - ref)))
    assert max_diff < 2e-2, f"mismatch vs reference, max abs diff={max_diff}"

    print("KERNEL_OK")
</pallas_src>

<mosaic_0001>
module attributes {stable_mosaic.version = 11 : i64} {
  func.func @_transformer_salary_kernel(%arg0: i32, %arg1: memref<8x32xf32, #tpu.memory_space<vmem>>, %arg2: memref<2x32x32xf32, #tpu.memory_space<vmem>>, %arg3: memref<2x1x32xf32, #tpu.memory_space<vmem>>, %arg4: memref<2x1x32xf32, #tpu.memory_space<vmem>>, %arg5: memref<2x1x32xf32, #tpu.memory_space<vmem>>, %arg6: memref<2x1x32xf32, #tpu.memory_space<vmem>>, %arg7: memref<2x1x32xf32, #tpu.memory_space<vmem>>, %arg8: memref<2x32x2048xbf16, #tpu.memory_space<vmem>>, %arg9: memref<2x1x2048xf32, #tpu.memory_space<vmem>>, %arg10: memref<2x2048x32xbf16, #tpu.memory_space<vmem>>, %arg11: memref<2x1x32xf32, #tpu.memory_space<vmem>>, %arg12: memref<32x16xf32, #tpu.memory_space<vmem>>, %arg13: memref<1x16xf32, #tpu.memory_space<vmem>>, %arg14: memref<16x8xf32, #tpu.memory_space<vmem>>, %arg15: memref<1x8xf32, #tpu.memory_space<vmem>>, %arg16: memref<8x8xf32, #tpu.memory_space<vmem>>) attributes {dimension_semantics = [#tpu.dimension_semantics<parallel>], iteration_bounds = array<i64: 1>, scalar_prefetch = 0 : i64, scratch_operands = 0 : i64, tpu.core_type = #tpu.core_type<tc>, window_params = [{transform_indices = @transform_0, window_bounds = array<i64: 8, 32>}, {pipeline_mode = #tpu.pipeline_mode<synchronous>, transform_indices = @transform_1, window_bounds = array<i64: 2, 32, 32>}, {pipeline_mode = #tpu.pipeline_mode<synchronous>, transform_indices = @transform_2, window_bounds = array<i64: 2, 1, 32>}, {pipeline_mode = #tpu.pipeline_mode<synchronous>, transform_indices = @transform_3, window_bounds = array<i64: 2, 1, 32>}, {pipeline_mode = #tpu.pipeline_mode<synchronous>, transform_indices = @transform_4, window_bounds = array<i64: 2, 1, 32>}, {pipeline_mode = #tpu.pipeline_mode<synchronous>, transform_indices = @transform_5, window_bounds = array<i64: 2, 1, 32>}, {pipeline_mode = #tpu.pipeline_mode<synchronous>, transform_indices = @transform_6, window_bounds = array<i64: 2, 1, 32>}, {pipeline_mode = #tpu.pipeline_mode<synchronous>, transform_indices = @transform_7, window_bounds = array<i64: 2, 32, 2048>}, {pipeline_mode = #tpu.pipeline_mode<synchronous>, transform_indices = @transform_8, window_bounds = array<i64: 2, 1, 2048>}, {pipeline_mode = #tpu.pipeline_mode<synchronous>, transform_indices = @transform_9, window_bounds = array<i64: 2, 2048, 32>}, {pipeline_mode = #tpu.pipeline_mode<synchronous>, transform_indices = @transform_10, window_bounds = array<i64: 2, 1, 32>}, {pipeline_mode = #tpu.pipeline_mode<synchronous>, transform_indices = @transform_11, window_bounds = array<i64: 32, 16>}, {pipeline_mode = #tpu.pipeline_mode<synchronous>, transform_indices = @transform_12, window_bounds = array<i64: 1, 16>}, {pipeline_mode = #tpu.pipeline_mode<synchronous>, transform_indices = @transform_13, window_bounds = array<i64: 16, 8>}, {pipeline_mode = #tpu.pipeline_mode<synchronous>, transform_indices = @transform_14, window_bounds = array<i64: 1, 8>}, {transform_indices = @transform_15, window_bounds = array<i64: 8, 8>}]} {
    %c0 = arith.constant 0 : index
    %c0_0 = arith.constant 0 : index
    %0 = vector.load %arg1[%c0, %c0_0] : memref<8x32xf32, #tpu.memory_space<vmem>>, vector<8x32xf32>
    %c0_1 = arith.constant 0 : index
    %c0_2 = arith.constant 0 : index
    %c0_3 = arith.constant 0 : index
    %1 = vector.load %arg2[%c0_1, %c0_2, %c0_3] : memref<2x32x32xf32, #tpu.memory_space<vmem>>, vector<1x32x32xf32>
    %2 = vector.shape_cast %1 : vector<1x32x32xf32> to vector<32x32xf32>
    %cst = arith.constant dense<0.000000e+00> : vector<8x32xf32>
    %3 = tpu.matmul %0, %2, %cst {dimension_numbers = #tpu.dot_dimension_numbers<[1], [0], [0], [1], [0, 0, 1, 1], [], []>} : vector<8x32xf32>, vector<32x32xf32>, vector<8x32xf32> -> vector<8x32xf32>
    %c0_4 = arith.constant 0 : index
    %c0_5 = arith.constant 0 : index
    %c0_6 = arith.constant 0 : index
    %4 = vector.load %arg3[%c0_4, %c0_5, %c0_6] : memref<2x1x32xf32, #tpu.memory_space<vmem>>, vector<1x1x32xf32>
    %5 = vector.shape_cast %4 : vector<1x1x32xf32> to vector<1x32xf32>
    %6 = vector.broadcast %5 : vector<1x32xf32> to vector<8x32xf32>
    %7 = arith.addf %3, %6 : vector<8x32xf32>
    %8 = arith.addf %0, %7 : vector<8x32xf32>
    %c0_7 = arith.constant 0 : index
    %c0_8 = arith.constant 0 : index
    %c0_9 = arith.constant 0 : index
    %9 = vector.load %arg4[%c0_7, %c0_8, %c0_9] : memref<2x1x32xf32, #tpu.memory_space<vmem>>, vector<1x1x32xf32>
    %10 = vector.shape_cast %9 : vector<1x1x32xf32> to vector<1x32xf32>
    %c0_10 = arith.constant 0 : index
    %c0_11 = arith.constant 0 : index
    %c0_12 = arith.constant 0 : index
    %11 = vector.load %arg5[%c0_10, %c0_11, %c0_12] : memref<2x1x32xf32, #tpu.memory_space<vmem>>, vector<1x1x32xf32>
    %12 = vector.shape_cast %11 : vector<1x1x32xf32> to vector<1x32xf32>
    %cst_13 = arith.constant dense<0.000000e+00> : vector<8xf32>
    %13 = vector.multi_reduction <add>, %8, %cst_13 [1] : vector<8x32xf32> to vector<8xf32>
    %14 = vector.shape_cast %13 : vector<8xf32> to vector<8x1xf32>
    %cst_14 = arith.constant 3.200000e+01 : f32
    %15 = vector.broadcast %cst_14 : f32 to vector<8x1xf32>
    %16 = arith.divf %14, %15 : vector<8x1xf32>
    %17 = vector.broadcast %16 : vector<8x1xf32> to vector<8x32xf32>
    %18 = arith.subf %8, %17 : vector<8x32xf32>
    %19 = arith.mulf %18, %18 : vector<8x32xf32>
    %cst_15 = arith.constant dense<0.000000e+00> : vector<8xf32>
    %20 = vector.multi_reduction <add>, %19, %cst_15 [1] : vector<8x32xf32> to vector<8xf32>
    %21 = vector.shape_cast %20 : vector<8xf32> to vector<8x1xf32>
    %cst_16 = arith.constant 3.200000e+01 : f32
    %22 = vector.broadcast %cst_16 : f32 to vector<8x1xf32>
    %23 = arith.divf %21, %22 : vector<8x1xf32>
    %24 = vector.broadcast %16 : vector<8x1xf32> to vector<8x32xf32>
    %25 = arith.subf %8, %24 : vector<8x32xf32>
    %cst_17 = arith.constant 9.99999974E-6 : f32
    %26 = vector.broadcast %cst_17 : f32 to vector<8x1xf32>
    %27 = arith.addf %23, %26 : vector<8x1xf32>
    %28 = math.rsqrt %27 : vector<8x1xf32>
    %29 = vector.broadcast %28 : vector<8x1xf32> to vector<8x32xf32>
    %30 = arith.mulf %25, %29 : vector<8x32xf32>
    %31 = vector.broadcast %10 : vector<1x32xf32> to vector<8x32xf32>
    %32 = arith.mulf %30, %31 : vector<8x32xf32>
    %33 = vector.broadcast %12 : vector<1x32xf32> to vector<8x32xf32>
    %34 = arith.addf %32, %33 : vector<8x32xf32>
    %35 = arith.truncf %34 : vector<8x32xf32> to vector<8x32xbf16>
    %c0_18 = arith.constant 0 : index
    %c0_19 = arith.constant 0 : index
    %c0_20 = arith.constant 0 : index
    %36 = vector.load %arg8[%c0_18, %c0_19, %c0_20] : memref<2x32x2048xbf16, #tpu.memory_space<vmem>>, vector<1x32x2048xbf16>
    %37 = vector.shape_cast %36 : vector<1x32x2048xbf16> to vector<32x2048xbf16>
    %cst_21 = arith.constant dense<0.000000e+00> : vector<8x2048xf32>
    %38 = tpu.matmul %35, %37, %cst_21 {dimension_numbers = #tpu.dot_dimension_numbers<[1], [0], [0], [1], [0, 0, 1, 1], [], []>} : vector<8x32xbf16>, vector<32x2048xbf16>, vector<8x2048xf32> -> vector<8x2048xf32>
    %c0_22 = arith.constant 0 : index
    %c0_23 = arith.constant 0 : index
    %c0_24 = arith.constant 0 : index
    %39 = vector.load %arg9[%c0_22, %c0_23, %c0_24] : memref<2x1x2048xf32, #tpu.memory_space<vmem>>, vector<1x1x2048xf32>
    %40 = vector.shape_cast %39 : vector<1x1x2048xf32> to vector<1x2048xf32>
    %41 = vector.broadcast %40 : vector<1x2048xf32> to vector<8x2048xf32>
    %42 = arith.addf %38, %41 : vector<8x2048xf32>
    %cst_25 = arith.constant 0.000000e+00 : f32
    %43 = vector.broadcast %cst_25 : f32 to vector<8x2048xf32>
    %44 = arith.maximumf %42, %43 : vector<8x2048xf32>
    %45 = arith.truncf %44 : vector<8x2048xf32> to vector<8x2048xbf16>
    %c0_26 = arith.constant 0 : index
    %c0_27 = arith.constant 0 : index
    %c0_28 = arith.constant 0 : index
    %46 = vector.load %arg10[%c0_26, %c0_27, %c0_28] : memref<2x2048x32xbf16, #tpu.memory_space<vmem>>, vector<1x2048x32xbf16>
    %47 = vector.shape_cast %46 : vector<1x2048x32xbf16> to vector<2048x32xbf16>
    %cst_29 = arith.constant dense<0.000000e+00> : vector<8x32xf32>
    %48 = tpu.matmul %45, %47, %cst_29 {dimension_numbers = #tpu.dot_dimension_numbers<[1], [0], [0], [1], [0, 0, 1, 1], [], []>} : vector<8x2048xbf16>, vector<2048x32xbf16>, vector<8x32xf32> -> vector<8x32xf32>
    %c0_30 = arith.constant 0 : index
    %c0_31 = arith.constant 0 : index
    %c0_32 = arith.constant 0 : index
    %49 = vector.load %arg11[%c0_30, %c0_31, %c0_32] : memref<2x1x32xf32, #tpu.memory_space<vmem>>, vector<1x1x32xf32>
    %50 = vector.shape_cast %49 : vector<1x1x32xf32> to vector<1x32xf32>
    %51 = vector.broadcast %50 : vector<1x32xf32> to vector<8x32xf32>
    %52 = arith.addf %48, %51 : vector<8x32xf32>
    %53 = arith.addf %34, %52 : vector<8x32xf32>
    %c0_33 = arith.constant 0 : index
    %c0_34 = arith.constant 0 : index
    %c0_35 = arith.constant 0 : index
    %54 = vector.load %arg6[%c0_33, %c0_34, %c0_35] : memref<2x1x32xf32, #tpu.memory_space<vmem>>, vector<1x1x32xf32>
    %55 = vector.shape_cast %54 : vector<1x1x32xf32> to vector<1x32xf32>
    %c0_36 = arith.constant 0 : index
    %c0_37 = arith.constant 0 : index
    %c0_38 = arith.constant 0 : index
    %56 = vector.load %arg7[%c0_36, %c0_37, %c0_38] : memref<2x1x32xf32, #tpu.memory_space<vmem>>, vector<1x1x32xf32>
    %57 = vector.shape_cast %56 : vector<1x1x32xf32> to vector<1x32xf32>
    %cst_39 = arith.constant dense<0.000000e+00> : vector<8xf32>
    %58 = vector.multi_reduction <add>, %53, %cst_39 [1] : vector<8x32xf32> to vector<8xf32>
    %59 = vector.shape_cast %58 : vector<8xf32> to vector<8x1xf32>
    %cst_40 = arith.constant 3.200000e+01 : f32
    %60 = vector.broadcast %cst_40 : f32 to vector<8x1xf32>
    %61 = arith.divf %59, %60 : vector<8x1xf32>
    %62 = vector.broadcast %61 : vector<8x1xf32> to vector<8x32xf32>
    %63 = arith.subf %53, %62 : vector<8x32xf32>
    %64 = arith.mulf %63, %63 : vector<8x32xf32>
    %cst_41 = arith.constant dense<0.000000e+00> : vector<8xf32>
    %65 = vector.multi_reduction <add>, %64, %cst_41 [1] : vector<8x32xf32> to vector<8xf32>
    %66 = vector.shape_cast %65 : vector<8xf32> to vector<8x1xf32>
    %cst_42 = arith.constant 3.200000e+01 : f32
    %67 = vector.broadcast %cst_42 : f32 to vector<8x1xf32>
    %68 = arith.divf %66, %67 : vector<8x1xf32>
    %69 = vector.broadcast %61 : vector<8x1xf32> to vector<8x32xf32>
    %70 = arith.subf %53, %69 : vector<8x32xf32>
    %cst_43 = arith.constant 9.99999974E-6 : f32
    %71 = vector.broadcast %cst_43 : f32 to vector<8x1xf32>
    %72 = arith.addf %68, %71 : vector<8x1xf32>
    %73 = math.rsqrt %72 : vector<8x1xf32>
    %74 = vector.broadcast %73 : vector<8x1xf32> to vector<8x32xf32>
    %75 = arith.mulf %70, %74 : vector<8x32xf32>
    %76 = vector.broadcast %55 : vector<1x32xf32> to vector<8x32xf32>
    %77 = arith.mulf %75, %76 : vector<8x32xf32>
    %78 = vector.broadcast %57 : vector<1x32xf32> to vector<8x32xf32>
    %79 = arith.addf %77, %78 : vector<8x32xf32>
    %c1 = arith.constant 1 : index
    %c0_44 = arith.constant 0 : index
    %c0_45 = arith.constant 0 : index
    %80 = vector.load %arg2[%c1, %c0_44, %c0_45] : memref<2x32x32xf32, #tpu.memory_space<vmem>>, vector<1x32x32xf32>
    %81 = vector.shape_cast %80 : vector<1x32x32xf32> to vector<32x32xf32>
    %cst_46 = arith.constant dense<0.000000e+00> : vector<8x32xf32>
    %82 = tpu.matmul %79, %81, %cst_46 {dimension_numbers = #tpu.dot_dimension_numbers<[1], [0], [0], [1], [0, 0, 1, 1], [], []>} : vector<8x32xf32>, vector<32x32xf32>, vector<8x32xf32> -> vector<8x32xf32>
    %c1_47 = arith.constant 1 : index
    %c0_48 = arith.constant 0 : index
    %c0_49 = arith.constant 0 : index
    %83 = vector.load %arg3[%c1_47, %c0_48, %c0_49] : memref<2x1x32xf32, #tpu.memory_space<vmem>>, vector<1x1x32xf32>
    %84 = vector.shape_cast %83 : vector<1x1x32xf32> to vector<1x32xf32>
    %85 = vector.broadcast %84 : vector<1x32xf32> to vector<8x32xf32>
    %86 = arith.addf %82, %85 : vector<8x32xf32>
    %87 = arith.addf %79, %86 : vector<8x32xf32>
    %c1_50 = arith.constant 1 : index
    %c0_51 = arith.constant 0 : index
    %c0_52 = arith.constant 0 : index
    %88 = vector.load %arg4[%c1_50, %c0_51, %c0_52] : memref<2x1x32xf32, #tpu.memory_space<vmem>>, vector<1x1x32xf32>
    %89 = vector.shape_cast %88 : vector<1x1x32xf32> to vector<1x32xf32>
    %c1_53 = arith.constant 1 : index
    %c0_54 = arith.constant 0 : index
    %c0_55 = arith.constant 0 : index
    %90 = vector.load %arg5[%c1_53, %c0_54, %c0_55] : memref<2x1x32xf32, #tpu.memory_space<vmem>>, vector<1x1x32xf32>
    %91 = vector.shape_cast %90 : vector<1x1x32xf32> to vector<1x32xf32>
    %cst_56 = arith.constant dense<0.000000e+00> : vector<8xf32>
    %92 = vector.multi_reduction <add>, %87, %cst_56 [1] : vector<8x32xf32> to vector<8xf32>
    %93 = vector.shape_cast %92 : vector<8xf32> to vector<8x1xf32>
    %cst_57 = arith.constant 3.200000e+01 : f32
    %94 = vector.broadcast %cst_57 : f32 to vector<8x1xf32>
    %95 = arith.divf %93, %94 : vector<8x1xf32>
    %96 = vector.broadcast %95 : vector<8x1xf32> to vector<8x32xf32>
    %97 = arith.subf %87, %96 : vector<8x32xf32>
    %98 = arith.mulf %97, %97 : vector<8x32xf32>
    %cst_58 = arith.constant dense<0.000000e+00> : vector<8xf32>
    %99 = vector.multi_reduction <add>, %98, %cst_58 [1] : vector<8x32xf32> to vector<8xf32>
    %100 = vector.shape_cast %99 : vector<8xf32> to vector<8x1xf32>
    %cst_59 = arith.constant 3.200000e+01 : f32
    %101 = vector.broadcast %cst_59 : f32 to vector<8x1xf32>
    %102 = arith.divf %100, %101 : vector<8x1xf32>
    %103 = vector.broadcast %95 : vector<8x1xf32> to vector<8x32xf32>
    %104 = arith.subf %87, %103 : vector<8x32xf32>
    %cst_60 = arith.constant 9.99999974E-6 : f32
    %105 = vector.broadcast %cst_60 : f32 to vector<8x1xf32>
    %106 = arith.addf %102, %105 : vector<8x1xf32>
    %107 = math.rsqrt %106 : vector<8x1xf32>
    %108 = vector.broadcast %107 : vector<8x1xf32> to vector<8x32xf32>
    %109 = arith.mulf %104, %108 : vector<8x32xf32>
    %110 = vector.broadcast %89 : vector<1x32xf32> to vector<8x32xf32>
    %111 = arith.mulf %109, %110 : vector<8x32xf32>
    %112 = vector.broadcast %91 : vector<1x32xf32> to vector<8x32xf32>
    %113 = arith.addf %111, %112 : vector<8x32xf32>
    %114 = arith.truncf %113 : vector<8x32xf32> to vector<8x32xbf16>
    %c1_61 = arith.constant 1 : index
    %c0_62 = arith.constant 0 : index
    %c0_63 = arith.constant 0 : index
    %115 = vector.load %arg8[%c1_61, %c0_62, %c0_63] : memref<2x32x2048xbf16, #tpu.memory_space<vmem>>, vector<1x32x2048xbf16>
    %116 = vector.shape_cast %115 : vector<1x32x2048xbf16> to vector<32x2048xbf16>
    %cst_64 = arith.constant dense<0.000000e+00> : vector<8x2048xf32>
    %117 = tpu.matmul %114, %116, %cst_64 {dimension_numbers = #tpu.dot_dimension_numbers<[1], [0], [0], [1], [0, 0, 1, 1], [], []>} : vector<8x32xbf16>, vector<32x2048xbf16>, vector<8x2048xf32> -> vector<8x2048xf32>
    %c1_65 = arith.constant 1 : index
    %c0_66 = arith.constant 0 : index
    %c0_67 = arith.constant 0 : index
    %118 = vector.load %arg9[%c1_65, %c0_66, %c0_67] : memref<2x1x2048xf32, #tpu.memory_space<vmem>>, vector<1x1x2048xf32>
    %119 = vector.shape_cast %118 : vector<1x1x2048xf32> to vector<1x2048xf32>
    %120 = vector.broadcast %119 : vector<1x2048xf32> to vector<8x2048xf32>
    %121 = arith.addf %117, %120 : vector<8x2048xf32>
    %cst_68 = arith.constant 0.000000e+00 : f32
    %122 = vector.broadcast %cst_68 : f32 to vector<8x2048xf32>
    %123 = arith.maximumf %121, %122 : vector<8x2048xf32>
    %124 = arith.truncf %123 : vector<8x2048xf32> to vector<8x2048xbf16>
    %c1_69 = arith.constant 1 : index
    %c0_70 = arith.constant 0 : index
    %c0_71 = arith.constant 0 : index
    %125 = vector.load %arg10[%c1_69, %c0_70, %c0_71] : memref<2x2048x32xbf16, #tpu.memory_space<vmem>>, vector<1x2048x32xbf16>
    %126 = vector.shape_cast %125 : vector<1x2048x32xbf16> to vector<2048x32xbf16>
    %cst_72 = arith.constant dense<0.000000e+00> : vector<8x32xf32>
    %127 = tpu.matmul %124, %126, %cst_72 {dimension_numbers = #tpu.dot_dimension_numbers<[1], [0], [0], [1], [0, 0, 1, 1], [], []>} : vector<8x2048xbf16>, vector<2048x32xbf16>, vector<8x32xf32> -> vector<8x32xf32>
    %c1_73 = arith.constant 1 : index
    %c0_74 = arith.constant 0 : index
    %c0_75 = arith.constant 0 : index
    %128 = vector.load %arg11[%c1_73, %c0_74, %c0_75] : memref<2x1x32xf32, #tpu.memory_space<vmem>>, vector<1x1x32xf32>
    %129 = vector.shape_cast %128 : vector<1x1x32xf32> to vector<1x32xf32>
    %130 = vector.broadcast %129 : vector<1x32xf32> to vector<8x32xf32>
    %131 = arith.addf %127, %130 : vector<8x32xf32>
    %132 = arith.addf %113, %131 : vector<8x32xf32>
    %c1_76 = arith.constant 1 : index
    %c0_77 = arith.constant 0 : index
    %c0_78 = arith.constant 0 : index
    %133 = vector.load %arg6[%c1_76, %c0_77, %c0_78] : memref<2x1x32xf32, #tpu.memory_space<vmem>>, vector<1x1x32xf32>
    %134 = vector.shape_cast %133 : vector<1x1x32xf32> to vector<1x32xf32>
    %c1_79 = arith.constant 1 : index
    %c0_80 = arith.constant 0 : index
    %c0_81 = arith.constant 0 : index
    %135 = vector.load %arg7[%c1_79, %c0_80, %c0_81] : memref<2x1x32xf32, #tpu.memory_space<vmem>>, vector<1x1x32xf32>
    %136 = vector.shape_cast %135 : vector<1x1x32xf32> to vector<1x32xf32>
    %cst_82 = arith.constant dense<0.000000e+00> : vector<8xf32>
    %137 = vector.multi_reduction <add>, %132, %cst_82 [1] : vector<8x32xf32> to vector<8xf32>
    %138 = vector.shape_cast %137 : vector<8xf32> to vector<8x1xf32>
    %cst_83 = arith.constant 3.200000e+01 : f32
    %139 = vector.broadcast %cst_83 : f32 to vector<8x1xf32>
    %140 = arith.divf %138, %139 : vector<8x1xf32>
    %141 = vector.broadcast %140 : vector<8x1xf32> to vector<8x32xf32>
    %142 = arith.subf %132, %141 : vector<8x32xf32>
    %143 = arith.mulf %142, %142 : vector<8x32xf32>
    %cst_84 = arith.constant dense<0.000000e+00> : vector<8xf32>
    %144 = vector.multi_reduction <add>, %143, %cst_84 [1] : vector<8x32xf32> to vector<8xf32>
    %145 = vector.shape_cast %144 : vector<8xf32> to vector<8x1xf32>
    %cst_85 = arith.constant 3.200000e+01 : f32
    %146 = vector.broadcast %cst_85 : f32 to vector<8x1xf32>
    %147 = arith.divf %145, %146 : vector<8x1xf32>
    %148 = vector.broadcast %140 : vector<8x1xf32> to vector<8x32xf32>
    %149 = arith.subf %132, %148 : vector<8x32xf32>
    %cst_86 = arith.constant 9.99999974E-6 : f32
    %150 = vector.broadcast %cst_86 : f32 to vector<8x1xf32>
    %151 = arith.addf %147, %150 : vector<8x1xf32>
    %152 = math.rsqrt %151 : vector<8x1xf32>
    %153 = vector.broadcast %152 : vector<8x1xf32> to vector<8x32xf32>
    %154 = arith.mulf %149, %153 : vector<8x32xf32>
    %155 = vector.broadcast %134 : vector<1x32xf32> to vector<8x32xf32>
    %156 = arith.mulf %154, %155 : vector<8x32xf32>
    %157 = vector.broadcast %136 : vector<1x32xf32> to vector<8x32xf32>
    %158 = arith.addf %156, %157 : vector<8x32xf32>
    %c0_87 = arith.constant 0 : index
    %c0_88 = arith.constant 0 : index
    %159 = vector.load %arg12[%c0_87, %c0_88] : memref<32x16xf32, #tpu.memory_space<vmem>>, vector<32x16xf32>
    %cst_89 = arith.constant dense<0.000000e+00> : vector<8x16xf32>
    %160 = tpu.matmul %158, %159, %cst_89 {dimension_numbers = #tpu.dot_dimension_numbers<[1], [0], [0], [1], [0, 0, 1, 1], [], []>} : vector<8x32xf32>, vector<32x16xf32>, vector<8x16xf32> -> vector<8x16xf32>
    %c0_90 = arith.constant 0 : index
    %c0_91 = arith.constant 0 : index
    %161 = vector.load %arg13[%c0_90, %c0_91] : memref<1x16xf32, #tpu.memory_space<vmem>>, vector<1x16xf32>
    %162 = vector.broadcast %161 : vector<1x16xf32> to vector<8x16xf32>
    %163 = arith.addf %160, %162 : vector<8x16xf32>
    %cst_92 = arith.constant 0.000000e+00 : f32
    %164 = vector.broadcast %cst_92 : f32 to vector<8x16xf32>
    %165 = arith.maximumf %163, %164 : vector<8x16xf32>
    %c0_93 = arith.constant 0 : index
    %c0_94 = arith.constant 0 : index
    %166 = vector.load %arg14[%c0_93, %c0_94] : memref<16x8xf32, #tpu.memory_space<vmem>>, vector<16x8xf32>
    %cst_95 = arith.constant dense<0.000000e+00> : vector<8x8xf32>
    %167 = tpu.matmul %165, %166, %cst_95 {dimension_numbers = #tpu.dot_dimension_numbers<[1], [0], [0], [1], [0, 0, 1, 1], [], []>} : vector<8x16xf32>, vector<16x8xf32>, vector<8x8xf32> -> vector<8x8xf32>
    %c0_96 = arith.constant 0 : index
    %c0_97 = arith.constant 0 : index
    %168 = vector.load %arg15[%c0_96, %c0_97] : memref<1x8xf32, #tpu.memory_space<vmem>>, vector<1x8xf32>
    %169 = vector.broadcast %168 : vector<1x8xf32> to vector<8x8xf32>
    %170 = arith.addf %167, %169 : vector<8x8xf32>
    %c0_98 = arith.constant 0 : index
    %c0_99 = arith.constant 0 : index
    %171 = vector.load %arg16[%c0_98, %c0_99] : memref<8x8xf32, #tpu.memory_space<vmem>>, vector<8x8xf32>
    tpu.vector_store %arg16[%c0_98, %c0_99], %170 {strides = array<i32>} : memref<8x8xf32, #tpu.memory_space<vmem>>, vector<8x8xf32>,
    return
  }
  func.func @transform_0(%arg0: i32) -> (i32, i32) {
    %c0_i32 = arith.constant 0 : i32
    %c0_i32_0 = arith.constant 0 : i32
    return %arg0, %c0_i32 : i32, i32
  }
  func.func @transform_1(%arg0: i32) -> (i32, i32, i32) {
    %c0_i32 = arith.constant 0 : i32
    %c0_i32_0 = arith.constant 0 : i32
    %c0_i32_1 = arith.constant 0 : i32
    %c0_i32_2 = arith.constant 0 : i32
    return %c0_i32, %c0_i32_0, %c0_i32_1 : i32, i32, i32
  }
  func.func @transform_2(%arg0: i32) -> (i32, i32, i32) {
    %c0_i32 = arith.constant 0 : i32
    %c0_i32_0 = arith.constant 0 : i32
    %c0_i32_1 = arith.constant 0 : i32
    %c0_i32_2 = arith.constant 0 : i32
    return %c0_i32, %c0_i32_0, %c0_i32_1 : i32, i32, i32
  }
  func.func @transform_3(%arg0: i32) -> (i32, i32, i32) {
    %c0_i32 = arith.constant 0 : i32
    %c0_i32_0 = arith.constant 0 : i32
    %c0_i32_1 = arith.constant 0 : i32
    %c0_i32_2 = arith.constant 0 : i32
    return %c0_i32, %c0_i32_0, %c0_i32_1 : i32, i32, i32
  }
  func.func @transform_4(%arg0: i32) -> (i32, i32, i32) {
    %c0_i32 = arith.constant 0 : i32
    %c0_i32_0 = arith.constant 0 : i32
    %c0_i32_1 = arith.constant 0 : i32
    %c0_i32_2 = arith.constant 0 : i32
    return %c0_i32, %c0_i32_0, %c0_i32_1 : i32, i32, i32
  }
  func.func @transform_5(%arg0: i32) -> (i32, i32, i32) {
    %c0_i32 = arith.constant 0 : i32
    %c0_i32_0 = arith.constant 0 : i32
    %c0_i32_1 = arith.constant 0 : i32
    %c0_i32_2 = arith.constant 0 : i32
    return %c0_i32, %c0_i32_0, %c0_i32_1 : i32, i32, i32
  }
  func.func @transform_6(%arg0: i32) -> (i32, i32, i32) {
    %c0_i32 = arith.constant 0 : i32
    %c0_i32_0 = arith.constant 0 : i32
    %c0_i32_1 = arith.constant 0 : i32
    %c0_i32_2 = arith.constant 0 : i32
    return %c0_i32, %c0_i32_0, %c0_i32_1 : i32, i32, i32
  }
  func.func @transform_7(%arg0: i32) -> (i32, i32, i32) {
    %c0_i32 = arith.constant 0 : i32
    %c0_i32_0 = arith.constant 0 : i32
    %c0_i32_1 = arith.constant 0 : i32
    %c0_i32_2 = arith.constant 0 : i32
    return %c0_i32, %c0_i32_0, %c0_i32_1 : i32, i32, i32
  }
  func.func @transform_8(%arg0: i32) -> (i32, i32, i32) {
    %c0_i32 = arith.constant 0 : i32
    %c0_i32_0 = arith.constant 0 : i32
    %c0_i32_1 = arith.constant 0 : i32
    %c0_i32_2 = arith.constant 0 : i32
    return %c0_i32, %c0_i32_0, %c0_i32_1 : i32, i32, i32
  }
  func.func @transform_9(%arg0: i32) -> (i32, i32, i32) {
    %c0_i32 = arith.constant 0 : i32
    %c0_i32_0 = arith.constant 0 : i32
    %c0_i32_1 = arith.constant 0 : i32
    %c0_i32_2 = arith.constant 0 : i32
    return %c0_i32, %c0_i32_0, %c0_i32_1 : i32, i32, i32
  }
  func.func @transform_10(%arg0: i32) -> (i32, i32, i32) {
    %c0_i32 = arith.constant 0 : i32
    %c0_i32_0 = arith.constant 0 : i32
    %c0_i32_1 = arith.constant 0 : i32
    %c0_i32_2 = arith.constant 0 : i32
    return %c0_i32, %c0_i32_0, %c0_i32_1 : i32, i32, i32
  }
  func.func @transform_11(%arg0: i32) -> (i32, i32) {
    %c0_i32 = arith.constant 0 : i32
    %c0_i32_0 = arith.constant 0 : i32
    %c0_i32_1 = arith.constant 0 : i32
    return %c0_i32, %c0_i32_0 : i32, i32
  }
  func.func @transform_12(%arg0: i32) -> (i32, i32) {
    %c0_i32 = arith.constant 0 : i32
    %c0_i32_0 = arith.constant 0 : i32
    %c0_i32_1 = arith.constant 0 : i32
    return %c0_i32, %c0_i32_0 : i32, i32
  }
  func.func @transform_13(%arg0: i32) -> (i32, i32) {
    %c0_i32 = arith.constant 0 : i32
    %c0_i32_0 = arith.constant 0 : i32
    %c0_i32_1 = arith.constant 0 : i32
    return %c0_i32, %c0_i32_0 : i32, i32
  }
  func.func @transform_14(%arg0: i32) -> (i32, i32) {
    %c0_i32 = arith.constant 0 : i32
    %c0_i32_0 = arith.constant 0 : i32
    %c0_i32_1 = arith.constant 0 : i32
    return %c0_i32, %c0_i32_0 : i32, i32
  }
  func.func @transform_15(%arg0: i32) -> (i32, i32) {
    %c0_i32 = arith.constant 0 : i32
    %c0_i32_0 = arith.constant 0 : i32
    return %arg0, %c0_i32 : i32, i32
  }
}

</mosaic_0001>

<bundles_post_ra>
// kernel: tpu_custom_call.1
= control target key start
LH: loop header
LB: loop body
LE: loop exit
PB: predicated region body
PF: predicated region fallthrough
CT: control target
= control target key end

     0   :  { %vm61_vm0 = vcmask 261120   ;;  %s7234_s0 = inlined_call_operand.vmem [shape: f32[8,32], index: 0, kind: input, shape index: {}]   ;;  %s7235_s1 = inlined_call_operand.vmem [shape: f32[2,32,32], index: 1, kind: input, shape index: {}]   ;;  %s7236_s2 = inlined_call_operand.vmem [shape: f32[2,1,32], index: 2, kind: input, shape index: {}]   ;;  %s7237_s3 = inlined_call_operand.vmem [shape: f32[2,1,32], index: 3, kind: input, shape index: {}]   ;;  %s7238_s4 = inlined_call_operand.vmem [shape: f32[2,1,32], index: 4, kind: input, shape index: {}]   ;;  %s7239_s5 = inlined_call_operand.vmem [shape: f32[2,1,32], index: 5, kind: input, shape index: {}]   ;;  %s7240_s6 = inlined_call_operand.vmem [shape: f32[2,1,32], index: 6, kind: input, shape index: {}]   ;;  %s7241_s7 = inlined_call_operand.vmem [shape: bf16[2,32,2048], index: 7, kind: input, shape index: {}]   ;;  %s7242_s8 = inlined_call_operand.vmem [shape: f32[2,1,2048], index: 8, kind: input, shape index: {}]   ;;  %s7243_s9 = inlined_call_operand.vmem [shape: bf16[2,2048,32], index: 9, kind: input, shape index: {}]   ;;  %s7244_s10 = inlined_call_operand.vmem [shape: f32[2,1,32], index: 10, kind: input, shape index: {}]   ;;  %s7245_s11 = inlined_call_operand.vmem [shape: f32[32,16], index: 11, kind: input, shape index: {}]   ;;  %s7246_s12 = inlined_call_operand.vmem [shape: f32[1,16], index: 12, kind: input, shape index: {}]   ;;  %s7247_s13 = inlined_call_operand.vmem [shape: f32[16,8], index: 13, kind: input, shape index: {}]   ;;  %s7248_s14 = inlined_call_operand.vmem [shape: f32[1,8], index: 14, kind: input, shape index: {}]   ;;  %s7249_s15 = inlined_call_operand.hbm [shape: f32[8,8], index: 15, kind: output, shape index: {}]  }
   0x1   :  { %v56_v0 = vld [vmem:[%s7235_s1 + $0x18] sm:$0xff]  ;;  %v55_v1 = vld [vmem:[%s7235_s1 + $0x10] sm:$0xff]  ;;  %v54_v2 = vld [vmem:[%s7235_s1 + $0x8] sm:$0xff] }
   0x2   :  { %77 = vmatpush.msra.mxu0 %v56_v0  ;;  %v53_v3 = vld [vmem:[%s7235_s1] sm:$0xff] }
   0x3   :  { %v52_v4 = vld [vmem:[%s7234_s0] sm:$0xff] }
   0x4   :  { %78 = vmatpush.msra.mxu0 %v55_v1 }
   0x6   :  { %79 = vmatpush.msra.mxu0 %v54_v2 }
   0x7   :  { %20 = vsyncpa [#allocation3], 0  ;;  %v5699_v5 = vld [vmem:[%s7236_s2] ss:$0 sm:$0xff]  ;;  %v5749_v10 = vmov 32.0   ;;  %vm3719_vm14 = vcmask 130048  }
   0x8   :  { %80 = vmatpush.msra.mxu0 %v53_v3  ;;  %5713 = vrcp.f32 %v5749_v10  ;;  %v3828_v22 = vld [vmem:[%s7241_s7 + $0x80] sm:$0xf]  ;;  %v5393_v24 = vld [vmem:[%s7241_s7 + $0x84] sm:$0xf]  ;;  %v3836_v27 = vld [vmem:[%s7241_s7 + $0x88] sm:$0xf] }
   0x9   :  { %3761 = vmatmul.msk.f32.vlgmr.msra.gmra.mxu0 %vm61_vm0, %v52_v4  ;;  %v5401_v23 = vld [vmem:[%s7241_s7 + $0xbc] sm:$0xf0]  ;;  %v3830_v26 = vld [vmem:[%s7241_s7 + $0xc0] sm:$0xf0]  ;;  %v5402_v28 = vld [vmem:[%s7241_s7 + $0xc4] sm:$0xf0] }
   0xa   :  { %v3829_v25 = vor.u32 %v5401_v23, %v3828_v22  ;;  %v3833_v29 = vor.u32 %v5393_v24, %v3830_v26  ;;  %v3837_v30 = vor.u32 %v5402_v28, %v3836_v27  ;;  %v5394_v31 = vld [vmem:[%s7241_s7 + $0x8c] sm:$0xf]  ;;  %v3764_v34 = vld [vmem:[%s7241_s7] sm:$0xf]  ;;  %v5377_v36 = vld [vmem:[%s7241_s7 + $0x4] sm:$0xf] }
   0xb   :  { %v3838_v32 = vld [vmem:[%s7241_s7 + $0xc8] sm:$0xf0]  ;;  %v5385_v35 = vld [vmem:[%s7241_s7 + $0x3c] sm:$0xf0]  ;;  %v3766_v38 = vld [vmem:[%s7241_s7 + $0x40] sm:$0xf0] }
   0xc   :  { %363 = vmatpush.bf16.msra.mxu1 %v3829_v25  ;;  %v3841_v33 = vor.u32 %v5394_v31, %v3838_v32  ;;  %376 = vmatpush.bf16.msra.mxu2 %v3833_v29  ;;  %v3765_v37 = vor.u32 %v5385_v35, %v3764_v34  ;;  %v3772_v39 = vld [vmem:[%s7241_s7 + $0x8] sm:$0xf]  ;;  %v3769_v41 = vor.u32 %v5377_v36, %v3766_v38  ;;  %v5378_v43 = vld [vmem:[%s7241_s7 + $0xc] sm:$0xf]  ;;  %v3844_v47 = vld [vmem:[%s7241_s7 + $0x90] sm:$0xf] }
   0xd   :  { %389 = vmatpush.bf16.msra.mxu3 %v3837_v30  ;;  %v5386_v40 = vld [vmem:[%s7241_s7 + $0x44] sm:$0xf0]  ;;  %v3774_v44 = vld [vmem:[%s7241_s7 + $0x48] sm:$0xf0]  ;;  %v5403_v48 = vld [vmem:[%s7241_s7 + $0xcc] sm:$0xf0] }
   0xe   :  { %v5714_v11 = vpop.eup %5713  ;;  %402 = vmatpush.bf16.msrb.mxu0 %v3841_v33  ;;  %v3773_v42 = vor.u32 %v5386_v40, %v3772_v39  ;;  %v3777_v45 = vor.u32 %v5378_v43, %v3774_v44  ;;  %v5395_v49 = vld [vmem:[%s7241_s7 + $0x94] sm:$0xf]  ;;  %v3845_v51 = vor.u32 %v5403_v48, %v3844_v47  ;;  %v3852_v53 = vld [vmem:[%s7241_s7 + $0x98] sm:$0xf]  ;;  %v5396_v57 = vld [vmem:[%s7241_s7 + $0x9c] sm:$0xf] }
   0xf   :  { %v92_v12 = vmul.f32 32.0, %v5714_v11  ;;  %vm96_vm1 = vweird.f32 %v5714_v11  ;;  %v3846_v52 = vld [vmem:[%s7241_s7 + $0xd0] sm:$0xf0]  ;;  %v5404_v54 = vld [vmem:[%s7241_s7 + $0xd4] sm:$0xf0]  ;;  %s5750_s20 = smov [#allocation2]  }
  0x10   :  { %364 = vmatpush.bf16.msra.mxu1 %v3765_v37  ;;  %377 = vmatpush.bf16.msra.mxu2 %v3769_v41  ;;  %v3849_v55 = vor.u32 %v5395_v49, %v3846_v52  ;;  %v3853_v56 = vor.u32 %v5404_v54, %v3852_v53  ;;  %v3854_v58 = vld [vmem:[%s7241_s7 + $0xd8] sm:$0xf0]  ;;  %v3780_v59 = vld [vmem:[%s7241_s7 + $0x10] sm:$0xf]  ;;  %v5379_v63 = vld [vmem:[%s7241_s7 + $0x14] sm:$0xf] }
  0x11   :  { %v93_v13 = vsub.f32 1.0, %v92_v12  ;;  %390 = vmatpush.bf16.msra.mxu3 %v3773_v42  ;;  %v3857_v61 = vor.u32 %v5396_v57, %v3854_v58  ;;  %v5387_v62 = vld [vmem:[%s7241_s7 + $0x4c] sm:$0xf0]  ;;  %v3782_v1 = vld [vmem:[%s7241_s7 + $0x50] sm:$0xf0]  ;;  %s3752_s22 = sshll.u32 %s7249_s15, 4  ;;  %s3753_s22 = int_to_ptr.hbm [resolvable:$true] %s3752_s22 }
  0x12   :  { %403 = vmatpush.bf16.msrb.mxu0 %v3777_v45  ;;  %v3781_v0 = vor.u32 %v5387_v62, %v3780_v59  ;;  %v3788_v2 = vld [vmem:[%s7241_s7 + $0x18] sm:$0xf]  ;;  %v3860_v22 = vld [vmem:[%s7241_s7 + $0xa0] sm:$0xf]  ;;  %v5397_v24 = vld [vmem:[%s7241_s7 + $0xa4] sm:$0xf] }
  0x13   :  { %v94_v14 = vmul.f32 %v5714_v11, %v93_v13  ;;  %v5388_v3 = vld [vmem:[%s7241_s7 + $0x54] sm:$0xf0]  ;;  %v5405_v23 = vld [vmem:[%s7241_s7 + $0xdc] sm:$0xf0]  ;;  %v3862_v25 = vld [vmem:[%s7241_s7 + $0xe0] sm:$0xf0] }
  0x14   :  { %415 = vmatpush.bf16.msrb.mxu1 %v3845_v51  ;;  %428 = vmatpush.bf16.msrb.mxu2 %v3849_v55  ;;  %v5406_v27 = vld [vmem:[%s7241_s7 + $0xe4] sm:$0xf0]  ;;  %v5398_v28 = vld [vmem:[%s7241_s7 + $0xac] sm:$0xf]  ;;  %v3861_v31 = vor.u32 %v5405_v23, %v3860_v22  ;;  %v3865_v32 = vor.u32 %v5397_v24, %v3862_v25  ;;  %v3796_v33 = vld [vmem:[%s7241_s7 + $0x20] sm:$0xf] }
  0x15   :  { %v95_v15 = vadd.f32 %v5714_v11, %v94_v14  ;;  %441 = vmatpush.bf16.msrb.mxu3 %v3853_v56  ;;  %v3870_v29 = vld [vmem:[%s7241_s7 + $0xe8] sm:$0xf0]  ;;  %v5389_v34 = vld [vmem:[%s7241_s7 + $0x5c] sm:$0xf0]  ;;  %v5381_v37 = vld [vmem:[%s7241_s7 + $0x24] sm:$0xf] }
  0x16   :  { %454 = vmatpush.bf16.msra.mxu0 %v3857_v61  ;;  %v3873_v36 = vor.u32 %v5398_v28, %v3870_v29  ;;  %v3798_v38 = vld [vmem:[%s7241_s7 + $0x60] sm:$0xf0]  ;;  %v3804_v39 = vld [vmem:[%s7241_s7 + $0x28] sm:$0xf]  ;;  %v5382_v41 = vld [vmem:[%s7241_s7 + $0x2c] sm:$0xf]  ;;  %v3797_v43 = vor.u32 %v5389_v34, %v3796_v33 }
  0x17   :  { %v5851_v16 = vsel %vm96_vm1, %v5714_v11, %v95_v15  ;;  %v5700_v15 = vld [vmem:[%s7237_s3] ss:$0 sm:$0xff]  ;;  %v5390_v40 = vld [vmem:[%s7241_s7 + $0x64] sm:$0xf0]  ;;  %v3806_v42 = vld [vmem:[%s7241_s7 + $0x68] sm:$0xf0]  ;;  %v3801_v44 = vor.u32 %v5381_v37, %v3798_v38 }
  0x18   :  { %416 = vmatpush.bf16.msrb.mxu1 %v3781_v0  ;;  %v3805_v45 = vor.u32 %v5390_v40, %v3804_v39  ;;  %v3876_v47 = vld [vmem:[%s7241_s7 + $0xb0] sm:$0xf]  ;;  %v5399_v49 = vld [vmem:[%s7241_s7 + $0xb4] sm:$0xf]  ;;  %v3884_v51 = vld [vmem:[%s7241_s7 + $0xb8] sm:$0xf] }
  0x19   :  { %v5407_v48 = vld [vmem:[%s7241_s7 + $0xec] sm:$0xf0]  ;;  %v5408_v52 = vld [vmem:[%s7241_s7 + $0xf4] sm:$0xf0]  ;;  %v5400_v53 = vld [vmem:[%s7241_s7 + $0xbc] sm:$0xf] }
  0x1a   :  { %v3886_v54 = vld [vmem:[%s7241_s7 + $0xf8] sm:$0xf0]  ;;  %v3877_v55 = vor.u32 %v5407_v48, %v3876_v47  ;;  %v3812_v57 = vld [vmem:[%s7241_s7 + $0x30] sm:$0xf]  ;;  %v3885_v59 = vor.u32 %v5408_v52, %v3884_v51  ;;  %v5383_v61 = vld [vmem:[%s7241_s7 + $0x34] sm:$0xf] }
  0x1b   :  { %v5391_v58 = vld [vmem:[%s7241_s7 + $0x6c] sm:$0xf0]  ;;  %v3814_v62 = vld [vmem:[%s7241_s7 + $0x70] sm:$0xf0]  ;;  %v5392_v0 = vld [vmem:[%s7241_s7 + $0x74] sm:$0xf0] }
  0x1c   :  { %v5437_v22 = vld [vmem:[%s7243_s9 + $0xe0] sm:$0xff]  ;;  %v5412_v25 = vld [vmem:[%s7243_s9 + $0x18] sm:$0xff]  ;;  %v5411_v29 = vld [vmem:[%s7243_s9 + $0x10] sm:$0xff]  ;;  %vm3743_vm15 = vcmask 64512  }
  0x1d   :  { %v5421_v23 = vld [vmem:[%s7243_s9 + $0x60] sm:$0xff]  ;;  %v5428_v28 = vld [vmem:[%s7243_s9 + $0x98] sm:$0xff]  ;;  %v5410_v33 = vld [vmem:[%s7243_s9 + $0x8] sm:$0xff] }
  0x1e   :  { %v5429_v24 = vld [vmem:[%s7243_s9 + $0xa0] sm:$0xff]  ;;  %v5434_v34 = vld [vmem:[%s7243_s9 + $0xc8] sm:$0xff]  ;;  %v5448_v39 = vld [vmem:[%s7243_s9 + $0x138] sm:$0xff] }
  0x1f   :  { %v5409_v37 = vld [vmem:[%s7243_s9] sm:$0xff]  ;;  %v5472_v40 = vld [vmem:[%s7243_s9 + $0x1f8] sm:$0xff]  ;;  %v5455_v47 = vld [vmem:[%s7243_s9 + $0x170] sm:$0xff] }
  0x20   :  { %v5433_v38 = vld [vmem:[%s7243_s9 + $0xc0] sm:$0xff]  ;;  %v5463_v48 = vld [vmem:[%s7243_s9 + $0x1b0] sm:$0xff]  ;;  %v5454_v51 = vld [vmem:[%s7243_s9 + $0x168] sm:$0xff] }
  0x21   :  { %v5462_v52 = vld [vmem:[%s7243_s9 + $0x1a8] sm:$0xff] }
  0x86   :  { %v82_v6 = vpop.f32.mrf.mxu0 }
  0x87   :  { %v83_v7 = vadd.f32 %v5699_v5, %v82_v6  ;;  %v3789_v5 = vor.u32 %v5388_v3, %v3788_v2  ;;  %v5380_v6 = vld [vmem:[%s7241_s7 + $0x1c] sm:$0xf]  ;;  %v3813_v3 = vor.u32 %v5391_v58, %v3812_v57 }
  0x88   :  { %v3822_v2 = vld [vmem:[%s7241_s7 + $0x78] sm:$0xf0] }
  0x89   :  { %v85_v8 = vadd.f32 %v83_v7, %v52_v4  ;;  %v3785_v4 = vor.u32 %v5379_v63, %v3782_v1  ;;  %v3790_v7 = vld [vmem:[%s7241_s7 + $0x58] sm:$0xf0]  ;;  %442 = vmatpush.bf16.msrb.mxu3 %v3789_v5  ;;  %v3820_v63 = vld [vmem:[%s7241_s7 + $0x38] sm:$0xf] }
  0x8a   :  { %v5384_v1 = vld [vmem:[%s7241_s7 + $0x3c] sm:$0xf]  ;;  %v3821_v5 = vor.u32 %v5392_v0, %v3820_v63  ;;  %v5442_v63 = vld [vmem:[%s7243_s9 + $0x108] sm:$0xff] }
  0x8b   :  { %v88_v9 = vsel %vm61_vm0, %v85_v8, 0.0  ;;  %429 = vmatpush.bf16.msrb.mxu2 %v3785_v4  ;;  %v3817_v4 = vor.u32 %v5383_v61, %v3814_v62  ;;  %v5444_v57 = vld [vmem:[%s7243_s9 + $0x118] sm:$0xff]  ;;  %v5466_v0 = vld [vmem:[%s7243_s9 + $0x1c8] sm:$0xff] }
  0x8c   :  { %89 = vadd.xlane.f32.xlu0 %v88_v9  ;;  %v5468_v58 = vld [vmem:[%s7243_s9 + $0x1d8] sm:$0xff] }
  0x8d   :  { %v5452_v61 = vld [vmem:[%s7243_s9 + $0x158] sm:$0xff] }
  0x8e   :  { %v5460_v62 = vld [vmem:[%s7243_s9 + $0x198] sm:$0xff] }
  0xff   :  { %v90_v17 = vpop.xlane.xlu0 %89 }
 0x100   :  { %v98_v18 = vmul.f32 %v5851_v16, %v90_v17 }
 0x102   :  { %v5854_v19 = vsub.f32 %v85_v8, %v98_v18  ;;  %v3793_v8 = vor.u32 %v5380_v6, %v3790_v7  ;;  %v5701_v18 = vld [vmem:[%s7238_s4] ss:$0 sm:$0xff]  ;;  %v3825_v6 = vor.u32 %v5384_v1, %v3822_v2  ;;  %v5416_v7 = vld [vmem:[%s7243_s9 + $0x38] sm:$0xff]  ;;  %v5451_v1 = vld [vmem:[%s7243_s9 + $0x150] sm:$0xff] }
 0x103   :  { %v5459_v2 = vld [vmem:[%s7243_s9 + $0x190] sm:$0xff] }
 0x104   :  { %v100_v20 = vmul.f32 %v5854_v19, %v5854_v19  ;;  %455 = vmatpush.bf16.msra.mxu0 %v3793_v8  ;;  %v5440_v8 = vld [vmem:[%s7243_s9 + $0xf8] sm:$0xff] }
 0x106   :  { %v101_v21 = vsel %vm61_vm0, %v100_v20, 0.0 }
 0x107   :  { %102 = vadd.xlane.f32.xlu0 %v101_v21 }
 0x17a   :  { %v103_v46 = vpop.xlane.xlu0 %102 }
 0x17b   :  { %v104_v50 = vmul.f32 %v103_v46, %v5851_v16  ;;  %v3809_v46 = vor.u32 %v5382_v41, %v3806_v42  ;;  %v5417_v41 = vld [vmem:[%s7243_s9 + $0x40] sm:$0xff] }
 0x17c   :  { %v5425_v42 = vld [vmem:[%s7243_s9 + $0x80] sm:$0xff] }
 0x17d   :  { %v105_v60 = vadd.f32 1e-05, %v104_v50  ;;  %v3878_v50 = vld [vmem:[%s7241_s7 + $0xf0] sm:$0xf0] }
 0x17e   :  { %v3881_v56 = vor.u32 %v5399_v49, %v3878_v50  ;;  %v5446_v49 = vld [vmem:[%s7243_s9 + $0x128] sm:$0xff] }
 0x17f   :  { %5715 = vrsqrt.f32 %v105_v60  ;;  %vm112_vm3 = vweird.f32 %v105_v60  ;;  %v5470_v50 = vld [vmem:[%s7243_s9 + $0x1e8] sm:$0xff] }
 0x185   :  { %v5716_v9 = vpop.eup %5715 }
 0x186   :  { %v107_v10 = vmul.f32 %v5716_v9, %v105_v60  ;;  %vm113_vm2 = vweird.f32 %v5716_v9  ;;  %v3889_v60 = vor.u32 %v5400_v53, %v3886_v54  ;;  %v5445_v53 = vld [vmem:[%s7243_s9 + $0x120] sm:$0xff] }
 0x187   :  { %vm114_vm4 = vmor %vm112_vm3, %vm113_vm2  ;;  %v5469_v54 = vld [vmem:[%s7243_s9 + $0x1e0] sm:$0xff] }
 0x188   :  { %v108_v11 = vmul.f32 %v5716_v9, %v107_v10  ;;  %v5432_v10 = vld [vmem:[%s7243_s9 + $0xb8] sm:$0xff] }
 0x18a   :  { %v109_v12 = vmul.f32 0.5, %v108_v11  ;;  %v5415_v11 = vld [vmem:[%s7243_s9 + $0x30] sm:$0xff] }
 0x18c   :  { %v110_v13 = vsub.f32 1.5, %v109_v12  ;;  %v5439_v12 = vld [vmem:[%s7243_s9 + $0xf0] sm:$0xff] }
 0x18e   :  { %v111_v14 = vmul.f32 %v5716_v9, %v110_v13  ;;  %v5423_v13 = vld [vmem:[%s7243_s9 + $0x70] sm:$0xff] }
 0x190   :  { %v115_v17 = vsel %vm114_vm4, %v5716_v9, %v111_v14  ;;  %v5424_v9 = vld [vmem:[%s7243_s9 + $0x78] sm:$0xff]  ;;  %v5431_v14 = vld [vmem:[%s7243_s9 + $0xb0] sm:$0xff] }
 0x191   :  { %v116_v20 = vmul.f32 %v115_v17, %v5854_v19  ;;  %v3868_v19 = vld [vmem:[%s7241_s7 + $0xa8] sm:$0xf] }
 0x192   :  { %v3869_v35 = vor.u32 %v5406_v27, %v3868_v19  ;;  %v5438_v17 = vld [vmem:[%s7243_s9 + $0xe8] sm:$0xff]  ;;  %v5436_v19 = vld [vmem:[%s7243_s9 + $0xd8] sm:$0xff] }
 0x193   :  { %v120_v21 = vmul.f32 %v5700_v15, %v116_v20  ;;  %v5414_v15 = vld [vmem:[%s7243_s9 + $0x28] sm:$0xff]  ;;  %v5420_v27 = vld [vmem:[%s7243_s9 + $0x58] sm:$0xff] }
 0x194   :  { %v5430_v20 = vld [vmem:[%s7243_s9 + $0xa8] sm:$0xff] }
 0x195   :  { %v5978_v26 = vadd.f32 %v5701_v18, %v120_v21  ;;  %v5422_v18 = vld [vmem:[%s7243_s9 + $0x68] sm:$0xff]  ;;  %v5413_v21 = vld [vmem:[%s7243_s9 + $0x20] sm:$0xff] }
 0x197   :  { %v5991_v30 = vpack.c.bf16 %v5978_v26, %v5978_v26 }
 0x199   :  { %3890 = vmatmul.msk.bf16.vlgmr.msra.gmra.mxu1 %vm61_vm0, %v5991_v30  ;;  %3891 = vmatmul.msk.bf16.vlgmr.msra.gmra.mxu2 %vm61_vm0, %v5991_v30 }
 0x19a   :  { %3892 = vmatmul.msk.bf16.vlgmr.msra.gmra.mxu3 %vm61_vm0, %v5991_v30  ;;  %3893 = vmatmul.msk.bf16.vlgmr.msrb.gmra.mxu0 %vm61_vm0, %v5991_v30 }
 0x19b   :  { %467 = vmatpush.bf16.msra.mxu1 %v3861_v31  ;;  %480 = vmatpush.bf16.msra.mxu2 %v3865_v32  ;;  %v5435_v31 = vld [vmem:[%s7243_s9 + $0xd0] sm:$0xff] }
 0x19c   :  { %493 = vmatpush.bf16.msra.mxu3 %v3869_v35  ;;  %506 = vmatpush.bf16.msrb.mxu0 %v3873_v36  ;;  %v5419_v32 = vld [vmem:[%s7243_s9 + $0x50] sm:$0xff]  ;;  %v5418_v35 = vld [vmem:[%s7243_s9 + $0x48] sm:$0xff] }
 0x19d   :  { %v5426_v36 = vld [vmem:[%s7243_s9 + $0x88] sm:$0xff] }
 0x19f   :  { %468 = vmatpush.bf16.msra.mxu1 %v3797_v43  ;;  %481 = vmatpush.bf16.msra.mxu2 %v3801_v44  ;;  %v5456_v43 = vld [vmem:[%s7243_s9 + $0x178] sm:$0xff] }
 0x1a0   :  { %494 = vmatpush.bf16.msra.mxu3 %v3805_v45  ;;  %507 = vmatpush.bf16.msrb.mxu0 %v3809_v46  ;;  %v5464_v44 = vld [vmem:[%s7243_s9 + $0x1b8] sm:$0xff]  ;;  %v5447_v45 = vld [vmem:[%s7243_s9 + $0x130] sm:$0xff] }
 0x1a1   :  { %v5471_v46 = vld [vmem:[%s7243_s9 + $0x1f0] sm:$0xff] }
 0x1a9   :  { %3894 = vmatmul.msk.bf16.vlgmr.msrb.gmra.mxu1 %vm61_vm0, %v5991_v30  ;;  %3895 = vmatmul.msk.bf16.vlgmr.msrb.gmra.mxu2 %vm61_vm0, %v5991_v30 }
 0x1aa   :  { %3896 = vmatmul.msk.bf16.vlgmr.msrb.gmra.mxu3 %vm61_vm0, %v5991_v30  ;;  %3897 = vmatmul.msk.bf16.vlgmr.msra.gmra.mxu0 %vm61_vm0, %v5991_v30 }
 0x1ab   :  { %519 = vmatpush.bf16.msrb.mxu1 %v3877_v55  ;;  %532 = vmatpush.bf16.msrb.mxu2 %v3881_v56  ;;  %v5453_v55 = vld [vmem:[%s7243_s9 + $0x160] sm:$0xff] }
 0x1ac   :  { %545 = vmatpush.bf16.msrb.mxu3 %v3885_v59  ;;  %558 = vmatpush.bf16.msra.mxu0 %v3889_v60  ;;  %v5461_v56 = vld [vmem:[%s7243_s9 + $0x1a0] sm:$0xff]  ;;  %v5443_v59 = vld [vmem:[%s7243_s9 + $0x110] sm:$0xff] }
 0x1ad   :  { %v5467_v60 = vld [vmem:[%s7243_s9 + $0x1d0] sm:$0xff] }
 0x1af   :  { %520 = vmatpush.bf16.msrb.mxu1 %v3813_v3  ;;  %533 = vmatpush.bf16.msrb.mxu2 %v3817_v4  ;;  %v5441_v3 = vld [vmem:[%s7243_s9 + $0x100] sm:$0xff] }
 0x1b0   :  { %546 = vmatpush.bf16.msrb.mxu3 %v3821_v5  ;;  %559 = vmatpush.bf16.msra.mxu0 %v3825_v6  ;;  %v5465_v4 = vld [vmem:[%s7243_s9 + $0x1c0] sm:$0xff]  ;;  %v5450_v5 = vld [vmem:[%s7243_s9 + $0x148] sm:$0xff] }
 0x1b1   :  { %v5458_v6 = vld [vmem:[%s7243_s9 + $0x188] sm:$0xff] }
 0x1b9   :  { %3898 = vmatmul.msk.bf16.vlgmr.msra.gmra.mxu1 %vm61_vm0, %v5991_v30  ;;  %3899 = vmatmul.msk.bf16.vlgmr.msra.gmra.mxu2 %vm61_vm0, %v5991_v30 }
 0x1ba   :  { %3900 = vmatmul.msk.bf16.vlgmr.msra.gmra.mxu3 %vm61_vm0, %v5991_v30  ;;  %3901 = vmatmul.msk.bf16.vlgmr.msrb.gmra.mxu0 %vm61_vm0, %v5991_v30 }
 0x1bb   :  { %1625 = vmatpush.bf16.msra.mxu1 %v5416_v7  ;;  %1664 = vmatpush.bf16.msrb.mxu0 %v5440_v8  ;;  %v5449_v7 = vld [vmem:[%s7243_s9 + $0x140] sm:$0xff] }
 0x1bc   :  { %1638 = vmatpush.bf16.msra.mxu2 %v5424_v9  ;;  %1651 = vmatpush.bf16.msra.mxu3 %v5432_v10  ;;  %v5457_v8 = vld [vmem:[%s7243_s9 + $0x180] sm:$0xff] }
 0x1bd   :  { %v6292_v9 = vld [vmem:[%s7242_s8] sm:$0xff] }
 0x1be   :  { %v162_v10 = vperm.slane %v6292_v9, 0 }
 0x1bf   :  { %1626 = vmatpush.bf16.msra.mxu1 %v5415_v11  ;;  %1665 = vmatpush.bf16.msrb.mxu0 %v5439_v12  ;;  %v165_v11 = vperm.slane %v6292_v9, 3 }
 0x1c0   :  { %1639 = vmatpush.bf16.msra.mxu2 %v5423_v13  ;;  %1652 = vmatpush.bf16.msra.mxu3 %v5431_v14 }
 0x1c3   :  { %1627 = vmatpush.bf16.msra.mxu1 %v5414_v15  ;;  %1666 = vmatpush.bf16.msrb.mxu0 %v5438_v17 }
 0x1c4   :  { %1640 = vmatpush.bf16.msra.mxu2 %v5422_v18  ;;  %1653 = vmatpush.bf16.msra.mxu3 %v5430_v20  ;;  %v163_v18 = vperm.slane %v6292_v9, 1 }
 0x1c7   :  { %1628 = vmatpush.bf16.msra.mxu1 %v5413_v21  ;;  %1667 = vmatpush.bf16.msrb.mxu0 %v5437_v22  ;;  %v164_v21 = vperm.slane %v6292_v9, 2  ;;  %v5480_v22 = vld [vmem:[%s7243_s9 + $0x238] sm:$0xff] }
 0x1c8   :  { %1641 = vmatpush.bf16.msra.mxu2 %v5421_v23  ;;  %1654 = vmatpush.bf16.msra.mxu3 %v5429_v24  ;;  %v5504_v24 = vld [vmem:[%s7243_s9 + $0x2f8] sm:$0xff] }
 0x1c9   :  { %3902 = vmatmul.msk.bf16.vlgmr.msrb.gmra.mxu1 %vm61_vm0, %v5991_v30  ;;  %3903 = vmatmul.msk.bf16.vlgmr.msrb.gmra.mxu2 %vm61_vm0, %v5991_v30 }
 0x1ca   :  { %3904 = vmatmul.msk.bf16.vlgmr.msrb.gmra.mxu3 %vm61_vm0, %v5991_v30  ;;  %3905 = vmatmul.msk.bf16.vlgmr.msra.gmra.mxu0 %vm61_vm0, %v5991_v30  ;;  %v5427_v30 = vld [vmem:[%s7243_s9 + $0x90] sm:$0xff] }
 0x1cb   :  { %1629 = vmatpush.bf16.msra.mxu1 %v5412_v25  ;;  %1668 = vmatpush.bf16.msrb.mxu0 %v5436_v19 }
 0x1cc   :  { %1642 = vmatpush.bf16.msra.mxu2 %v5420_v27  ;;  %1655 = vmatpush.bf16.msra.mxu3 %v5428_v28 }
 0x1cf   :  { %1630 = vmatpush.bf16.msra.mxu1 %v5411_v29  ;;  %1669 = vmatpush.bf16.msrb.mxu0 %v5435_v31 }
 0x1d0   :  { %1643 = vmatpush.bf16.msra.mxu2 %v5419_v32  ;;  %1656 = vmatpush.bf16.msra.mxu3 %v5427_v30  ;;  %v5479_v32 = vld [vmem:[%s7243_s9 + $0x230] sm:$0xff] }
 0x1d3   :  { %1631 = vmatpush.bf16.msra.mxu1 %v5410_v33  ;;  %1670 = vmatpush.bf16.msrb.mxu0 %v5434_v34  ;;  %v5503_v34 = vld [vmem:[%s7243_s9 + $0x2f0] sm:$0xff] }
 0x1d4   :  { %1644 = vmatpush.bf16.msra.mxu2 %v5418_v35  ;;  %1657 = vmatpush.bf16.msra.mxu3 %v5426_v36  ;;  %v5488_v36 = vld [vmem:[%s7243_s9 + $0x278] sm:$0xff] }
 0x1d7   :  { %1632 = vmatpush.bf16.msra.mxu1 %v5409_v37  ;;  %1671 = vmatpush.bf16.msrb.mxu0 %v5433_v38  ;;  %v5496_v38 = vld [vmem:[%s7243_s9 + $0x2b8] sm:$0xff] }
 0x1d8   :  { %1645 = vmatpush.bf16.msra.mxu2 %v5417_v41  ;;  %1658 = vmatpush.bf16.msra.mxu3 %v5425_v42  ;;  %v5502_v41 = vld [vmem:[%s7243_s9 + $0x2e8] sm:$0xff]  ;;  %v166_v42 = vperm.slane %v6292_v9, 4 }
 0x1db   :  { %1677 = vmatpush.bf16.msrb.mxu1 %v5448_v39  ;;  %1716 = vmatpush.bf16.msra.mxu0 %v5472_v40  ;;  %v5478_v40 = vld [vmem:[%s7243_s9 + $0x228] sm:$0xff] }
 0x1dc   :  { %1690 = vmatpush.bf16.msrb.mxu2 %v5456_v43  ;;  %1703 = vmatpush.bf16.msrb.mxu3 %v5464_v44  ;;  %v169_v44 = vperm.slane %v6292_v9, 7 }
 0x1df   :  { %1678 = vmatpush.bf16.msrb.mxu1 %v5447_v45  ;;  %1717 = vmatpush.bf16.msra.mxu0 %v5471_v46  ;;  %v5487_v45 = vld [vmem:[%s7243_s9 + $0x270] sm:$0xff] }
 0x1e0   :  { %1691 = vmatpush.bf16.msrb.mxu2 %v5455_v47  ;;  %1704 = vmatpush.bf16.msrb.mxu3 %v5463_v48  ;;  %v5495_v47 = vld [vmem:[%s7243_s9 + $0x2b0] sm:$0xff] }
 0x1e3   :  { %1679 = vmatpush.bf16.msrb.mxu1 %v5446_v49  ;;  %1718 = vmatpush.bf16.msra.mxu0 %v5470_v50  ;;  %v5477_v49 = vld [vmem:[%s7243_s9 + $0x220] sm:$0xff] }
 0x1e4   :  { %1692 = vmatpush.bf16.msrb.mxu2 %v5454_v51  ;;  %1705 = vmatpush.bf16.msrb.mxu3 %v5462_v52  ;;  %v5501_v52 = vld [vmem:[%s7243_s9 + $0x2e0] sm:$0xff] }
 0x1e7   :  { %1680 = vmatpush.bf16.msrb.mxu1 %v5445_v53  ;;  %1719 = vmatpush.bf16.msra.mxu0 %v5469_v54  ;;  %v5486_v54 = vld [vmem:[%s7243_s9 + $0x268] sm:$0xff] }
 0x1e8   :  { %1693 = vmatpush.bf16.msrb.mxu2 %v5453_v55  ;;  %1706 = vmatpush.bf16.msrb.mxu3 %v5461_v56  ;;  %v5494_v56 = vld [vmem:[%s7243_s9 + $0x2a8] sm:$0xff] }
 0x1eb   :  { %1681 = vmatpush.bf16.msrb.mxu1 %v5444_v57  ;;  %1720 = vmatpush.bf16.msra.mxu0 %v5468_v58  ;;  %v167_v57 = vperm.slane %v6292_v9, 5 }
 0x1ec   :  { %1694 = vmatpush.bf16.msrb.mxu2 %v5452_v61  ;;  %1707 = vmatpush.bf16.msrb.mxu3 %v5460_v62  ;;  %v5500_v62 = vld [vmem:[%s7243_s9 + $0x2d8] sm:$0xff] }
 0x1ef   :  { %1682 = vmatpush.bf16.msrb.mxu1 %v5443_v59  ;;  %1721 = vmatpush.bf16.msra.mxu0 %v5467_v60  ;;  %v168_v59 = vperm.slane %v6292_v9, 6  ;;  %v5476_v60 = vld [vmem:[%s7243_s9 + $0x218] sm:$0xff] }
 0x1f0   :  { %1695 = vmatpush.bf16.msrb.mxu2 %v5451_v1  ;;  %1708 = vmatpush.bf16.msrb.mxu3 %v5459_v2  ;;  %v5485_v1 = vld [vmem:[%s7243_s9 + $0x260] sm:$0xff] }
 0x1f3   :  { %1683 = vmatpush.bf16.msrb.mxu1 %v5442_v63  ;;  %1722 = vmatpush.bf16.msra.mxu0 %v5466_v0 }
 0x1f4   :  { %1696 = vmatpush.bf16.msrb.mxu2 %v5450_v5  ;;  %1709 = vmatpush.bf16.msrb.mxu3 %v5458_v6 }
 0x1f7   :  { %1684 = vmatpush.bf16.msrb.mxu1 %v5441_v3  ;;  %1723 = vmatpush.bf16.msra.mxu0 %v5465_v4  ;;  %v5493_v4 = vld [vmem:[%s7243_s9 + $0x2a0] sm:$0xff] }
 0x1f8   :  { %1697 = vmatpush.bf16.msrb.mxu2 %v5449_v7  ;;  %1710 = vmatpush.bf16.msrb.mxu3 %v5457_v8  ;;  %v5475_v7 = vld [vmem:[%s7243_s9 + $0x210] sm:$0xff] }
 0x216   :  { %v366_v12 = vpop.f32.mrf.mxu1 }
 0x217   :  { %v367_v13 = vadd.f32 %v366_v12, %v162_v10  ;;  %v405_v14 = vpop.f32.mrf.mxu0  ;;  %v5499_v10 = vld [vmem:[%s7243_s9 + $0x2d0] sm:$0xff]  ;;  %v5484_v12 = vld [vmem:[%s7243_s9 + $0x258] sm:$0xff] }
 0x218   :  { %v406_v15 = vadd.f32 %v405_v14, %v165_v11 }
 0x219   :  { %v565_v17 = vmax.f32 %v367_v13, 0.0  ;;  %v6368_v13 = vld [vmem:[%s7242_s8 + $0x8] sm:$0xff] }
 0x21a   :  { %v568_v20 = vmax.f32 %v406_v15, 0.0  ;;  %v5492_v15 = vld [vmem:[%s7243_s9 + $0x298] sm:$0xff] }
 0x21b   :  { %v581_v23 = vpack.c.bf16 %v565_v17, %v565_v17 }
 0x21c   :  { %v584_v25 = vpack.c.bf16 %v568_v20, %v568_v20  ;;  %v379_v19 = vpop.f32.mrf.mxu2  ;;  %v5498_v20 = vld [vmem:[%s7243_s9 + $0x2c8] sm:$0xff] }
 0x21d   :  { %v380_v27 = vadd.f32 %v379_v19, %v163_v18  ;;  %v392_v28 = vpop.f32.mrf.mxu3  ;;  %1633 = vmatmul.bf16.vlgmr.msra.gmra.mxu1 %v581_v23  ;;  %v5474_v18 = vld [vmem:[%s7243_s9 + $0x208] sm:$0xff]  ;;  %v173_v23 = vperm.slane %v6368_v13, 3  ;;  %v5491_v19 = vld [vmem:[%s7243_s9 + $0x290] sm:$0xff] }
 0x21e   :  { %v393_v29 = vadd.f32 %v392_v28, %v164_v21  ;;  %1672 = vmatmul.bf16.vlgmr.msrb.gmra.mxu0 %v584_v25  ;;  %1729 = vmatpush.bf16.msra.mxu1 %v5480_v22  ;;  %v368_v31 = vpop.f32.mrf.mxu1  ;;  %v170_v21 = vperm.slane %v6368_v13, 0  ;;  %v5473_v28 = vld [vmem:[%s7243_s9 + $0x200] sm:$0xff] }
 0x21f   :  { %v566_v30 = vmax.f32 %v380_v27, 0.0  ;;  %1768 = vmatpush.bf16.msrb.mxu0 %v5504_v24  ;;  %v407_v33 = vpop.f32.mrf.mxu0  ;;  %v5483_v24 = vld [vmem:[%s7243_s9 + $0x250] sm:$0xff] }
 0x220   :  { %v567_v35 = vmax.f32 %v393_v29, 0.0 }
 0x221   :  { %v582_v37 = vpack.c.bf16 %v566_v30, %v566_v30  ;;  %v5512_v30 = vld [vmem:[%s7243_s9 + $0x338] sm:$0xff] }
 0x222   :  { %v583_v39 = vpack.c.bf16 %v567_v35, %v567_v35  ;;  %1730 = vmatpush.bf16.msra.mxu1 %v5479_v32  ;;  %v5497_v32 = vld [vmem:[%s7243_s9 + $0x2c0] sm:$0xff]  ;;  %v5482_v35 = vld [vmem:[%s7243_s9 + $0x248] sm:$0xff] }
 0x223   :  { %1769 = vmatpush.bf16.msrb.mxu0 %v5503_v34  ;;  %1646 = vmatmul.bf16.vlgmr.msra.gmra.mxu2 %v582_v37  ;;  %v5536_v34 = vld [vmem:[%s7243_s9 + $0x3f8] sm:$0xff]  ;;  %v5490_v37 = vld [vmem:[%s7243_s9 + $0x288] sm:$0xff] }
 0x224   :  { %1659 = vmatmul.bf16.vlgmr.msra.gmra.mxu3 %v583_v39  ;;  %1742 = vmatpush.bf16.msra.mxu2 %v5488_v36  ;;  %v381_v43 = vpop.f32.mrf.mxu2 }
 0x225   :  { %1755 = vmatpush.bf16.msra.mxu3 %v5496_v38  ;;  %v394_v46 = vpop.f32.mrf.mxu3  ;;  %v171_v38 = vperm.slane %v6368_v13, 1 }
 0x226   :  { %1731 = vmatpush.bf16.msra.mxu1 %v5478_v40  ;;  %v418_v48 = vpop.f32.mrf.mxu1  ;;  %v172_v40 = vperm.slane %v6368_v13, 2  ;;  %v5481_v46 = vld [vmem:[%s7243_s9 + $0x240] sm:$0xff] }
 0x227   :  { %1770 = vmatpush.bf16.msrb.mxu0 %v5502_v41  ;;  %v419_v50 = vadd.f32 %v418_v48, %v166_v42  ;;  %v457_v51 = vpop.f32.mrf.mxu0  ;;  %v5511_v42 = vld [vmem:[%s7243_s9 + $0x330] sm:$0xff] }
 0x228   :  { %v458_v53 = vadd.f32 %v457_v51, %v169_v44  ;;  %1743 = vmatpush.bf16.msra.mxu2 %v5487_v45  ;;  %v5535_v45 = vld [vmem:[%s7243_s9 + $0x3f0] sm:$0xff] }
 0x229   :  { %v569_v55 = vmax.f32 %v419_v50, 0.0  ;;  %1756 = vmatpush.bf16.msra.mxu3 %v5495_v47  ;;  %v5520_v50 = vld [vmem:[%s7243_s9 + $0x378] sm:$0xff] }
 0x22a   :  { %v572_v58 = vmax.f32 %v458_v53, 0.0  ;;  %1732 = vmatpush.bf16.msra.mxu1 %v5477_v49  ;;  %v5489_v49 = vld [vmem:[%s7243_s9 + $0x280] sm:$0xff]  ;;  %v5528_v53 = vld [vmem:[%s7243_s9 + $0x3b8] sm:$0xff] }
 0x22b   :  { %v585_v61 = vpack.c.bf16 %v569_v55, %v569_v55  ;;  %1771 = vmatpush.bf16.msrb.mxu0 %v5501_v52 }
 0x22c   :  { %v588_v63 = vpack.c.bf16 %v572_v58, %v572_v58  ;;  %1744 = vmatpush.bf16.msra.mxu2 %v5486_v54  ;;  %v431_v0 = vpop.f32.mrf.mxu2  ;;  %v5534_v58 = vld [vmem:[%s7243_s9 + $0x3e8] sm:$0xff] }
 0x22d   :  { %1757 = vmatpush.bf16.msra.mxu3 %v5494_v56  ;;  %v432_v2 = vadd.f32 %v431_v0, %v167_v57  ;;  %v444_v3 = vpop.f32.mrf.mxu3  ;;  %1685 = vmatmul.bf16.vlgmr.msrb.gmra.mxu1 %v585_v61  ;;  %v5510_v56 = vld [vmem:[%s7243_s9 + $0x328] sm:$0xff] }
 0x22e   :  { %v445_v5 = vadd.f32 %v444_v3, %v168_v59  ;;  %1724 = vmatmul.bf16.vlgmr.msra.gmra.mxu0 %v588_v63  ;;  %1733 = vmatpush.bf16.msra.mxu1 %v5476_v60  ;;  %v420_v6 = vpop.f32.mrf.mxu1  ;;  %v5519_v60 = vld [vmem:[%s7243_s9 + $0x370] sm:$0xff]  ;;  %v5509_v63 = vld [vmem:[%s7243_s9 + $0x320] sm:$0xff]  ;;  %v5518_v3 = vld [vmem:[%s7243_s9 + $0x368] sm:$0xff] }
 0x22f   :  { %v570_v8 = vmax.f32 %v432_v2, 0.0  ;;  %1772 = vmatpush.bf16.msrb.mxu0 %v5500_v62  ;;  %v459_v9 = vpop.f32.mrf.mxu0  ;;  %v5527_v62 = vld [vmem:[%s7243_s9 + $0x3b0] sm:$0xff] }
 0x230   :  { %v571_v11 = vmax.f32 %v445_v5, 0.0  ;;  %1745 = vmatpush.bf16.msra.mxu2 %v5485_v1  ;;  %v5533_v1 = vld [vmem:[%s7243_s9 + $0x3e0] sm:$0xff]  ;;  %v5526_v5 = vld [vmem:[%s7243_s9 + $0x3a8] sm:$0xff] }
 0x231   :  { %v586_v14 = vpack.c.bf16 %v570_v8, %v570_v8  ;;  %1758 = vmatpush.bf16.msra.mxu3 %v5493_v4  ;;  %v5532_v8 = vld [vmem:[%s7243_s9 + $0x3d8] sm:$0xff]  ;;  %v5517_v9 = vld [vmem:[%s7243_s9 + $0x360] sm:$0xff] }
 0x232   :  { %v587_v17 = vpack.c.bf16 %v571_v11, %v571_v11  ;;  %1734 = vmatpush.bf16.msra.mxu1 %v5475_v7  ;;  %v5508_v7 = vld [vmem:[%s7243_s9 + $0x318] sm:$0xff]  ;;  %v5507_v11 = vld [vmem:[%s7243_s9 + $0x310] sm:$0xff] }
 0x233   :  { %1773 = vmatpush.bf16.msrb.mxu0 %v5499_v10  ;;  %1698 = vmatmul.bf16.vlgmr.msrb.gmra.mxu2 %v586_v14  ;;  %v5525_v10 = vld [vmem:[%s7243_s9 + $0x3a0] sm:$0xff] }
 0x234   :  { %1711 = vmatmul.bf16.vlgmr.msrb.gmra.mxu3 %v587_v17  ;;  %1746 = vmatpush.bf16.msra.mxu2 %v5484_v12  ;;  %v433_v22 = vpop.f32.mrf.mxu2  ;;  %v174_v12 = vperm.slane %v6368_v13, 4  ;;  %v177_v17 = vperm.slane %v6368_v13, 7 }
 0x235   :  { %1759 = vmatpush.bf16.msra.mxu3 %v5492_v15  ;;  %v446_v25 = vpop.f32.mrf.mxu3  ;;  %v5531_v15 = vld [vmem:[%s7243_s9 + $0x3d0] sm:$0xff]  ;;  %v5524_v22 = vld [vmem:[%s7243_s9 + $0x398] sm:$0xff] }
 0x236   :  { %1735 = vmatpush.bf16.msra.mxu1 %v5474_v18  ;;  %v470_v27 = vpop.f32.mrf.mxu1 }
 0x237   :  { %1774 = vmatpush.bf16.msrb.mxu0 %v5498_v20  ;;  %v471_v29 = vadd.f32 %v470_v27, %v170_v21  ;;  %v509_v31 = vpop.f32.mrf.mxu0  ;;  %v5516_v20 = vld [vmem:[%s7243_s9 + $0x358] sm:$0xff] }
 0x238   :  { %v510_v33 = vadd.f32 %v509_v31, %v173_v23  ;;  %1747 = vmatpush.bf16.msra.mxu2 %v5483_v24  ;;  %v5506_v24 = vld [vmem:[%s7243_s9 + $0x308] sm:$0xff]  ;;  %v5523_v31 = vld [vmem:[%s7243_s9 + $0x390] sm:$0xff] }
 0x239   :  { %v573_v36 = vmax.f32 %v471_v29, 0.0  ;;  %1760 = vmatpush.bf16.msra.mxu3 %v5491_v19  ;;  %v5530_v19 = vld [vmem:[%s7243_s9 + $0x3c8] sm:$0xff]  ;;  %v175_v29 = vperm.slane %v6368_v13, 5 }
 0x23a   :  { %v576_v39 = vmax.f32 %v510_v33, 0.0  ;;  %1736 = vmatpush.bf16.msra.mxu1 %v5473_v28  ;;  %v5515_v28 = vld [vmem:[%s7243_s9 + $0x350] sm:$0xff] }
 0x23b   :  { %v589_v41 = vpack.c.bf16 %v573_v36, %v573_v36  ;;  %1775 = vmatpush.bf16.msrb.mxu0 %v5497_v32  ;;  %v176_v32 = vperm.slane %v6368_v13, 6 }
 0x23c   :  { %v592_v43 = vpack.c.bf16 %v576_v39, %v576_v39  ;;  %1748 = vmatpush.bf16.msra.mxu2 %v5482_v35  ;;  %v483_v44 = vpop.f32.mrf.mxu2  ;;  %v5529_v35 = vld [vmem:[%s7243_s9 + $0x3c0] sm:$0xff]  ;;  %v5522_v39 = vld [vmem:[%s7243_s9 + $0x388] sm:$0xff] }
 0x23d   :  { %1761 = vmatpush.bf16.msra.mxu3 %v5490_v37  ;;  %v484_v47 = vadd.f32 %v483_v44, %v171_v38  ;;  %v496_v48 = vpop.f32.mrf.mxu3  ;;  %1737 = vmatmul.bf16.vlgmr.msra.gmra.mxu1 %v589_v41  ;;  %v5514_v38 = vld [vmem:[%s7243_s9 + $0x348] sm:$0xff] }
 0x23e   :  { %1781 = vmatpush.bf16.msrb.mxu1 %v5512_v30  ;;  %v497_v51 = vadd.f32 %v496_v48, %v172_v40  ;;  %1776 = vmatmul.bf16.vlgmr.msrb.gmra.mxu0 %v592_v43  ;;  %v472_v52 = vpop.f32.mrf.mxu1  ;;  %v5505_v30 = vld [vmem:[%s7243_s9 + $0x300] sm:$0xff] }
 0x23f   :  { %1820 = vmatpush.bf16.msra.mxu0 %v5536_v34  ;;  %v574_v54 = vmax.f32 %v484_v47, 0.0  ;;  %v511_v55 = vpop.f32.mrf.mxu0  ;;  %v5513_v43 = vld [vmem:[%s7243_s9 + $0x340] sm:$0xff] }
 0x240   :  { %v575_v57 = vmax.f32 %v497_v51, 0.0  ;;  %1749 = vmatpush.bf16.msra.mxu2 %v5481_v46 }
 0x241   :  { %v590_v59 = vpack.c.bf16 %v574_v54, %v574_v54  ;;  %1762 = vmatpush.bf16.msra.mxu3 %v5489_v49 }
 0x242   :  { %1782 = vmatpush.bf16.msrb.mxu1 %v5511_v42  ;;  %v591_v61 = vpack.c.bf16 %v575_v57, %v575_v57 }
 0x243   :  { %1821 = vmatpush.bf16.msra.mxu0 %v5535_v45  ;;  %1750 = vmatmul.bf16.vlgmr.msra.gmra.mxu2 %v590_v59  ;;  %v5521_v45 = vld [vmem:[%s7243_s9 + $0x380] sm:$0xff] }
 0x244   :  { %1794 = vmatpush.bf16.msrb.mxu2 %v5520_v50  ;;  %1763 = vmatmul.bf16.vlgmr.msra.gmra.mxu3 %v591_v61  ;;  %v485_v0 = vpop.f32.mrf.mxu2  ;;  %v5702_v61 = vld [vmem:[%s7244_s10] ss:$0 sm:$0xff] }
 0x245   :  { %1807 = vmatpush.bf16.msrb.mxu3 %v5528_v53  ;;  %v498_v2 = vpop.f32.mrf.mxu3 }
 0x246   :  { %1783 = vmatpush.bf16.msrb.mxu1 %v5510_v56  ;;  %v522_v4 = vpop.f32.mrf.mxu1 }
 0x247   :  { %1822 = vmatpush.bf16.msra.mxu0 %v5534_v58  ;;  %v561_v6 = vpop.f32.mrf.mxu0  ;;  %v523_v25 = vadd.f32 %v522_v4, %v174_v12 }
 0x248   :  { %1795 = vmatpush.bf16.msrb.mxu2 %v5519_v60  ;;  %v562_v27 = vadd.f32 %v561_v6, %v177_v17 }
 0x249   :  { %1808 = vmatpush.bf16.msrb.mxu3 %v5527_v62  ;;  %v577_v33 = vmax.f32 %v523_v25, 0.0 }
 0x24a   :  { %1784 = vmatpush.bf16.msrb.mxu1 %v5509_v63  ;;  %v580_v36 = vmax.f32 %v562_v27, 0.0 }
 0x24b   :  { %1823 = vmatpush.bf16.msra.mxu0 %v5533_v1  ;;  %v593_v41 = vpack.c.bf16 %v577_v33, %v577_v33 }
 0x24c   :  { %1796 = vmatpush.bf16.msrb.mxu2 %v5518_v3  ;;  %v535_v14 = vpop.f32.mrf.mxu2  ;;  %v596_v42 = vpack.c.bf16 %v580_v36, %v580_v36 }
 0x24d   :  { %1809 = vmatpush.bf16.msrb.mxu3 %v5526_v5  ;;  %v548_v18 = vpop.f32.mrf.mxu3  ;;  %v536_v13 = vadd.f32 %v535_v14, %v175_v29 }
 0x24e   :  { %1785 = vmatpush.bf16.msrb.mxu1 %v5508_v7  ;;  %v524_v21 = vpop.f32.mrf.mxu1  ;;  %v549_v40 = vadd.f32 %v548_v18, %v176_v32 }
 0x24f   :  { %1824 = vmatpush.bf16.msra.mxu0 %v5532_v8  ;;  %v563_v23 = vpop.f32.mrf.mxu0  ;;  %v578_v44 = vmax.f32 %v536_v13, 0.0 }
 0x250   :  { %1797 = vmatpush.bf16.msrb.mxu2 %v5517_v9  ;;  %v579_v46 = vmax.f32 %v549_v40, 0.0 }
 0x251   :  { %1810 = vmatpush.bf16.msrb.mxu3 %v5525_v10  ;;  %v594_v47 = vpack.c.bf16 %v578_v44, %v578_v44  ;;  %v4419_v44 = vld [vmem:[%s7235_s1 + $0x28] sm:$0xff] }
 0x252   :  { %1786 = vmatpush.bf16.msrb.mxu1 %v5507_v11  ;;  %v595_v48 = vpack.c.bf16 %v579_v46, %v579_v46 }
 0x253   :  { %1825 = vmatpush.bf16.msra.mxu0 %v5531_v15 }
 0x254   :  { %1798 = vmatpush.bf16.msrb.mxu2 %v5516_v20  ;;  %v537_v34 = vpop.f32.mrf.mxu2 }
 0x255   :  { %1811 = vmatpush.bf16.msrb.mxu3 %v5524_v22  ;;  %v550_v37 = vpop.f32.mrf.mxu3 }
 0x256   :  { %1787 = vmatpush.bf16.msrb.mxu1 %v5506_v24 }
 0x257   :  { %1826 = vmatpush.bf16.msra.mxu0 %v5530_v19 }
 0x258   :  { %1799 = vmatpush.bf16.msrb.mxu2 %v5515_v28 }
 0x259   :  { %1812 = vmatpush.bf16.msrb.mxu3 %v5523_v31 }
 0x25a   :  { %1788 = vmatpush.bf16.msrb.mxu1 %v5505_v30 }
 0x25b   :  { %1827 = vmatpush.bf16.msra.mxu0 %v5529_v35 }
 0x25c   :  { %1800 = vmatpush.bf16.msrb.mxu2 %v5514_v38 }
 0x25d   :  { %1813 = vmatpush.bf16.msrb.mxu3 %v5522_v39  ;;  %1789 = vmatmul.bf16.vlgmr.msrb.gmra.mxu1 %v593_v41 }
 0x25e   :  { %1828 = vmatmul.bf16.vlgmr.msra.gmra.mxu0 %v596_v42 }
 0x260   :  { %1801 = vmatpush.bf16.msrb.mxu2 %v5513_v43  ;;  %v4421_v43 = vld [vmem:[%s7235_s1 + $0x38] sm:$0xff] }
 0x261   :  { %1814 = vmatpush.bf16.msrb.mxu3 %v5521_v45  ;;  %1891 = vmatpush.msra.mxu1 %v4421_v43  ;;  %v4418_v45 = vld [vmem:[%s7235_s1 + $0x20] sm:$0xff] }
 0x263   :  { %1802 = vmatmul.bf16.vlgmr.msrb.gmra.mxu2 %v594_v47 }
 0x264   :  { %1815 = vmatmul.bf16.vlgmr.msrb.gmra.mxu3 %v595_v48 }
 0x29a   :  { %v1634_v49 = vpop.f32.mrf.mxu1 }
 0x29b   :  { %v1673_v50 = vpop.f32.mrf.mxu0  ;;  %v1635_v0 = vadd.f32 %v5702_v61, %v1634_v49  ;;  %v5705_v61 = vld [vmem:[%s7236_s2 + $0x1] ss:$0 sm:$0xff] }
 0x2a2   :  { %v1636_v51 = vpop.f32.mrf.mxu1 }
 0x2a3   :  { %v1675_v52 = vpop.f32.mrf.mxu0 }
 0x2a6   :  { %v1647_v53 = vpop.f32.mrf.mxu2 }
 0x2a7   :  { %v1660_v54 = vpop.f32.mrf.mxu3  ;;  %v1648_v3 = vadd.f32 %v1647_v53, %v1635_v0 }
 0x2a9   :  { %v1661_v6 = vadd.f32 %v1660_v54, %v1648_v3 }
 0x2aa   :  { %v1686_v55 = vpop.f32.mrf.mxu1 }
 0x2ab   :  { %v1725_v56 = vpop.f32.mrf.mxu0  ;;  %v1674_v9 = vadd.f32 %v1673_v50, %v1661_v6 }
 0x2ad   :  { %v1687_v12 = vadd.f32 %v1686_v55, %v1674_v9  ;;  %v5703_v55 = vld [vmem:[%s7239_s5] ss:$0 sm:$0xff]  ;;  %v5553_v9 = vld [vmem:[%s7241_s7 + $0x184] sm:$0xf] }
 0x2ae   :  { %v1649_v57 = vpop.f32.mrf.mxu2 }
 0x2af   :  { %v1662_v58 = vpop.f32.mrf.mxu3 }
 0x2b0   :  { %v5704_v58 = vld [vmem:[%s7240_s6] ss:$0 sm:$0xff] }
 0x2b2   :  { %v1688_v59 = vpop.f32.mrf.mxu1 }
 0x2b3   :  { %v1727_v60 = vpop.f32.mrf.mxu0 }
 0x2b6   :  { %v1699_v62 = vpop.f32.mrf.mxu2 }
 0x2b7   :  { %v1712_v63 = vpop.f32.mrf.mxu3  ;;  %v1700_v14 = vadd.f32 %v1699_v62, %v1687_v12  ;;  %v4534_v12 = vld [vmem:[%s7241_s7 + $0x188] sm:$0xf] }
 0x2b9   :  { %v1713_v15 = vadd.f32 %v1712_v63, %v1700_v14  ;;  %v5562_v14 = vld [vmem:[%s7241_s7 + $0x1c4] sm:$0xf0] }
 0x2ba   :  { %v1738_v1 = vpop.f32.mrf.mxu1 }
 0x2bb   :  { %v1777_v2 = vpop.f32.mrf.mxu0  ;;  %v1726_v20 = vadd.f32 %v1725_v56, %v1713_v15 }
 0x2bd   :  { %v1739_v21 = vadd.f32 %v1738_v1, %v1726_v20  ;;  %v4536_v20 = vld [vmem:[%s7241_s7 + $0x1c8] sm:$0xf0] }
 0x2be   :  { %v1701_v4 = vpop.f32.mrf.mxu2 }
 0x2bf   :  { %v1714_v5 = vpop.f32.mrf.mxu3 }
 0x2c2   :  { %v1740_v7 = vpop.f32.mrf.mxu1 }
 0x2c3   :  { %v1779_v8 = vpop.f32.mrf.mxu0  ;;  %v4526_v7 = vld [vmem:[%s7241_s7 + $0x180] sm:$0xf] }
 0x2c4   :  { %v5561_v8 = vld [vmem:[%s7241_s7 + $0x1bc] sm:$0xf0] }
 0x2c6   :  { %v1751_v10 = vpop.f32.mrf.mxu2 }
 0x2c7   :  { %v1764_v11 = vpop.f32.mrf.mxu3  ;;  %v1752_v23 = vadd.f32 %v1751_v10, %v1739_v21  ;;  %v4527_v10 = vor.u32 %v5561_v8, %v4526_v7  ;;  %v4558_v7 = vld [vmem:[%s7241_s7 + $0x1a0] sm:$0xf] }
 0x2c8   :  { %v5565_v8 = vld [vmem:[%s7241_s7 + $0x1dc] sm:$0xf0] }
 0x2c9   :  { %v1765_v25 = vadd.f32 %v1764_v11, %v1752_v23  ;;  %v4528_v11 = vld [vmem:[%s7241_s7 + $0x1c0] sm:$0xf0]  ;;  %2174 = vmatpush.bf16.msra.mxu2 %v4527_v10  ;;  %v5545_v23 = vld [vmem:[%s7241_s7 + $0x13c] sm:$0xf0] }
 0x2ca   :  { %v4531_v15 = vor.u32 %v5553_v9, %v4528_v11  ;;  %v5557_v9 = vld [vmem:[%s7241_s7 + $0x1a4] sm:$0xf] }
 0x2cb   :  { %v1778_v27 = vadd.f32 %v1777_v2, %v1765_v25  ;;  %v4560_v10 = vld [vmem:[%s7241_s7 + $0x1e0] sm:$0xf0] }
 0x2cc   :  { %2187 = vmatpush.bf16.msra.mxu3 %v4531_v15  ;;  %v4568_v15 = vld [vmem:[%s7241_s7 + $0x1e8] sm:$0xf0] }
 0x2ce   :  { %v1753_v17 = vpop.f32.mrf.mxu2 }
 0x2cf   :  { %v1766_v18 = vpop.f32.mrf.mxu3  ;;  %v4535_v17 = vor.u32 %v5562_v14, %v4534_v12  ;;  %v5566_v12 = vld [vmem:[%s7241_s7 + $0x1e4] sm:$0xf0]  ;;  %v5558_v14 = vld [vmem:[%s7241_s7 + $0x1ac] sm:$0xf] }
 0x2d0   :  { %v5554_v18 = vld [vmem:[%s7241_s7 + $0x18c] sm:$0xf] }
 0x2d1   :  { %v4539_v21 = vor.u32 %v5554_v18, %v4536_v20  ;;  %2200 = vmatpush.bf16.msrb.mxu0 %v4535_v17  ;;  %v4559_v18 = vor.u32 %v5565_v8, %v4558_v7  ;;  %v4563_v20 = vor.u32 %v5557_v9, %v4560_v10  ;;  %v5597_v7 = vld [vmem:[%s7243_s9 + $0x4e0] sm:$0xff]  ;;  %v5588_v10 = vld [vmem:[%s7243_s9 + $0x498] sm:$0xff] }
 0x2d2   :  { %v5573_v8 = vld [vmem:[%s7243_s9 + $0x420] sm:$0xff] }
 0x2d3   :  { %v5581_v9 = vld [vmem:[%s7243_s9 + $0x460] sm:$0xff] }
 0x2da   :  { %v1790_v22 = vpop.f32.mrf.mxu1 }
 0x2db   :  { %v1829_v24 = vpop.f32.mrf.mxu0  ;;  %v1791_v29 = vadd.f32 %v1790_v22, %v1778_v27  ;;  %v4462_v22 = vld [vmem:[%s7241_s7 + $0x100] sm:$0xf]  ;;  %v4470_v27 = vld [vmem:[%s7241_s7 + $0x108] sm:$0xf] }
 0x2dc   :  { %v4463_v25 = vor.u32 %v5545_v23, %v4462_v22  ;;  %v5549_v22 = vld [vmem:[%s7241_s7 + $0x15c] sm:$0xf0] }
 0x2de   :  { %2175 = vmatpush.bf16.msra.mxu2 %v4463_v25  ;;  %v5541_v25 = vld [vmem:[%s7241_s7 + $0x124] sm:$0xf] }
 0x2e2   :  { %v1792_v19 = vpop.f32.mrf.mxu1 }
 0x2e3   :  { %v1831_v28 = vpop.f32.mrf.mxu0  ;;  %v4464_v19 = vld [vmem:[%s7241_s7 + $0x140] sm:$0xf0] }
 0x2e4   :  { %v5546_v28 = vld [vmem:[%s7241_s7 + $0x144] sm:$0xf0] }
 0x2e6   :  { %v1803_v31 = vpop.f32.mrf.mxu2 }
 0x2e7   :  { %v1804_v32 = vadd.f32 %v1803_v31, %v1791_v29  ;;  %v1816_v30 = vpop.f32.mrf.mxu3  ;;  %v4471_v31 = vor.u32 %v5546_v28, %v4470_v27  ;;  %v4502_v27 = vld [vmem:[%s7241_s7 + $0x128] sm:$0xf] }
 0x2e8   :  { %v5550_v28 = vld [vmem:[%s7241_s7 + $0x164] sm:$0xf0] }
 0x2e9   :  { %v1817_v33 = vadd.f32 %v1816_v30, %v1804_v32  ;;  %v5538_v32 = vld [vmem:[%s7241_s7 + $0x10c] sm:$0xf]  ;;  %2201 = vmatpush.bf16.msrb.mxu0 %v4471_v31 }
 0x2ea   :  { %v4472_v30 = vld [vmem:[%s7241_s7 + $0x148] sm:$0xf0] }
 0x2eb   :  { %v1830_v34 = vadd.f32 %v1829_v24, %v1817_v33  ;;  %v5537_v24 = vld [vmem:[%s7241_s7 + $0x104] sm:$0xf]  ;;  %v4475_v33 = vor.u32 %v5538_v32, %v4472_v30  ;;  %v4504_v31 = vld [vmem:[%s7241_s7 + $0x168] sm:$0xf0] }
 0x2ec   :  { %v4467_v29 = vor.u32 %v5537_v24, %v4464_v19  ;;  %v4571_v24 = vor.u32 %v5558_v14, %v4568_v15  ;;  %v4496_v19 = vld [vmem:[%s7241_s7 + $0x160] sm:$0xf0]  ;;  %v5580_v14 = vld [vmem:[%s7243_s9 + $0x458] sm:$0xff]  ;;  %v5587_v15 = vld [vmem:[%s7243_s9 + $0x490] sm:$0xff] }
 0x2ed   :  { %v1833_v35 = vadd.f32 %v1830_v34, %v5978_v26  ;;  %v4420_v26 = vld [vmem:[%s7235_s1 + $0x30] sm:$0xff]  ;;  %v4499_v30 = vor.u32 %v5541_v25, %v4496_v19  ;;  %v5585_v25 = vld [vmem:[%s7243_s9 + $0x480] sm:$0xff] }
 0x2ee   :  { %v1805_v36 = vpop.f32.mrf.mxu2  ;;  %1892 = vmatpush.msra.mxu1 %v4420_v26  ;;  %2188 = vmatpush.bf16.msra.mxu3 %v4467_v29  ;;  %v5556_v26 = vld [vmem:[%s7241_s7 + $0x19c] sm:$0xf]  ;;  %v5542_v29 = vld [vmem:[%s7241_s7 + $0x12c] sm:$0xf]  ;;  %v5593_v19 = vld [vmem:[%s7243_s9 + $0x4c0] sm:$0xff] }
 0x2ef   :  { %v1818_v37 = vpop.f32.mrf.mxu3  ;;  %v1836_v38 = vsel %vm61_vm0, %v1833_v35, 0.0  ;;  %v5563_v36 = vld [vmem:[%s7241_s7 + $0x1cc] sm:$0xf0] }
 0x2f0   :  { %1837 = vadd.xlane.f32.xlu1 %v1836_v38  ;;  %1893 = vmatpush.msra.mxu1 %v4419_v44  ;;  %v5555_v37 = vld [vmem:[%s7241_s7 + $0x194] sm:$0xf]  ;;  %v4552_v44 = vld [vmem:[%s7241_s7 + $0x1d8] sm:$0xf0] }
 0x2f2   :  { %1894 = vmatpush.msra.mxu1 %v4418_v45  ;;  %v4478_v45 = vld [vmem:[%s7241_s7 + $0x110] sm:$0xf] }
 0x2f4   :  { %2213 = vmatpush.bf16.msrb.mxu1 %v4539_v21  ;;  %v4494_v21 = vld [vmem:[%s7241_s7 + $0x120] sm:$0xf] }
 0x2f5   :  { %v4495_v32 = vor.u32 %v5549_v22, %v4494_v21  ;;  %v5586_v21 = vld [vmem:[%s7243_s9 + $0x488] sm:$0xff] }
 0x2f6   :  { %v5594_v22 = vld [vmem:[%s7243_s9 + $0x4c8] sm:$0xff] }
 0x2f8   :  { %2214 = vmatpush.bf16.msrb.mxu1 %v4475_v33  ;;  %v4503_v33 = vor.u32 %v5550_v28, %v4502_v27  ;;  %v5624_v27 = vld [vmem:[%s7243_s9 + $0x5b8] sm:$0xff] }
 0x2f9   :  { %v5632_v28 = vld [vmem:[%s7243_s9 + $0x5f8] sm:$0xff] }
 0x363   :  { %v1838_v13 = vpop.xlane.xlu1 %1837 }
 0x364   :  { %v1839_v39 = vmul.f32 %v1838_v13, %v5851_v16 }
 0x366   :  { %v1840_v40 = vsub.f32 %v1833_v35, %v1839_v39  ;;  %v4542_v35 = vld [vmem:[%s7241_s7 + $0x190] sm:$0xf]  ;;  %v4544_v39 = vld [vmem:[%s7241_s7 + $0x1d0] sm:$0xf0] }
 0x367   :  { %v4543_v13 = vor.u32 %v5563_v36, %v4542_v35  ;;  %v4574_v35 = vld [vmem:[%s7241_s7 + $0x1b0] sm:$0xf] }
 0x368   :  { %v1841_v41 = vmul.f32 %v1840_v40, %v1840_v40  ;;  %v5567_v36 = vld [vmem:[%s7241_s7 + $0x1ec] sm:$0xf0] }
 0x369   :  { %2226 = vmatpush.bf16.msrb.mxu2 %v4543_v13  ;;  %v4582_v13 = vld [vmem:[%s7241_s7 + $0x1b8] sm:$0xf] }
 0x36a   :  { %v1842_v42 = vsel %vm61_vm0, %v1841_v41, 0.0  ;;  %v5564_v41 = vld [vmem:[%s7241_s7 + $0x1d4] sm:$0xf0] }
 0x36b   :  { %1843 = vadd.xlane.f32.xlu1 %v1842_v42  ;;  %v4547_v42 = vor.u32 %v5555_v37, %v4544_v39  ;;  %v5559_v37 = vld [vmem:[%s7241_s7 + $0x1b4] sm:$0xf]  ;;  %v5568_v39 = vld [vmem:[%s7241_s7 + $0x1f4] sm:$0xf0] }
 0x36d   :  { %2239 = vmatpush.bf16.msrb.mxu3 %v4547_v42  ;;  %v4575_v42 = vor.u32 %v5567_v36, %v4574_v35  ;;  %v5607_v35 = vld [vmem:[%s7243_s9 + $0x530] sm:$0xff] }
 0x36e   :  { %v5615_v36 = vld [vmem:[%s7243_s9 + $0x570] sm:$0xff] }
 0x3de   :  { %v1844_v46 = vpop.xlane.xlu1 %1843 }
 0x3df   :  { %v1845_v47 = vmul.f32 %v1844_v46, %v5851_v16 }
 0x3e1   :  { %v1846_v48 = vadd.f32 1e-05, %v1845_v47  ;;  %v4555_v47 = vor.u32 %v5556_v26, %v4552_v44  ;;  %v4510_v26 = vld [vmem:[%s7241_s7 + $0x130] sm:$0xf] }
 0x3e2   :  { %v5551_v44 = vld [vmem:[%s7241_s7 + $0x16c] sm:$0xf0] }
 0x3e3   :  { %5717 = vrsqrt.f32 %v1846_v48  ;;  %vm1853_vm6 = vweird.f32 %v1846_v48 }
 0x3e9   :  { %v5718_v49 = vpop.eup %5717 }
 0x3ea   :  { %v1848_v50 = vmul.f32 %v5718_v49, %v1846_v48  ;;  %vm1854_vm5 = vweird.f32 %v5718_v49  ;;  %v5547_v48 = vld [vmem:[%s7241_s7 + $0x14c] sm:$0xf0] }
 0x3eb   :  { %vm1855_vm7 = vmor %vm1853_vm6, %vm1854_vm5 }
 0x3ec   :  { %v1849_v51 = vmul.f32 %v5718_v49, %v1848_v50  ;;  %v4479_v50 = vor.u32 %v5547_v48, %v4478_v45  ;;  %v4583_v45 = vor.u32 %v5568_v39, %v4582_v13  ;;  %v4512_v48 = vld [vmem:[%s7241_s7 + $0x170] sm:$0xf0]  ;;  %v5606_v13 = vld [vmem:[%s7243_s9 + $0x528] sm:$0xff] }
 0x3ed   :  { %v5614_v39 = vld [vmem:[%s7243_s9 + $0x568] sm:$0xff] }
 0x3ee   :  { %v1850_v52 = vmul.f32 0.5, %v1849_v51  ;;  %v4480_v51 = vld [vmem:[%s7241_s7 + $0x150] sm:$0xf0]  ;;  %2227 = vmatpush.bf16.msrb.mxu2 %v4479_v50  ;;  %v5552_v50 = vld [vmem:[%s7241_s7 + $0x174] sm:$0xf0] }
 0x3f0   :  { %v1851_v53 = vsub.f32 1.5, %v1850_v52  ;;  %v4486_v52 = vld [vmem:[%s7241_s7 + $0x118] sm:$0xf] }
 0x3f2   :  { %v1852_v54 = vmul.f32 %v5718_v49, %v1851_v53  ;;  %v5548_v53 = vld [vmem:[%s7241_s7 + $0x154] sm:$0xf0] }
 0x3f4   :  { %v1856_v56 = vsel %vm1855_vm7, %v5718_v49, %v1852_v54  ;;  %v5539_v49 = vld [vmem:[%s7241_s7 + $0x114] sm:$0xf] }
 0x3f5   :  { %v1857_v57 = vmul.f32 %v1856_v56, %v1840_v40  ;;  %v4550_v40 = vld [vmem:[%s7241_s7 + $0x198] sm:$0xf]  ;;  %v4483_v54 = vor.u32 %v5539_v49, %v4480_v51  ;;  %v5540_v56 = vld [vmem:[%s7241_s7 + $0x11c] sm:$0xf] }
 0x3f6   :  { %v4551_v43 = vor.u32 %v5564_v41, %v4550_v40  ;;  %v5560_v40 = vld [vmem:[%s7241_s7 + $0x1bc] sm:$0xf]  ;;  %v4518_v49 = vld [vmem:[%s7241_s7 + $0x138] sm:$0xf] }
 0x3f7   :  { %v1861_v59 = vmul.f32 %v5703_v55, %v1857_v57  ;;  %v4487_v55 = vor.u32 %v5548_v53, %v4486_v52  ;;  %v4488_v57 = vld [vmem:[%s7241_s7 + $0x158] sm:$0xf0]  ;;  %2240 = vmatpush.bf16.msrb.mxu3 %v4483_v54  ;;  %v4511_v53 = vor.u32 %v5551_v44, %v4510_v26 }
 0x3f8   :  { %2252 = vmatpush.bf16.msra.mxu0 %v4551_v43  ;;  %v4584_v41 = vld [vmem:[%s7241_s7 + $0x1f8] sm:$0xf0] }
 0x3f9   :  { %v1865_v60 = vadd.f32 %v5704_v58, %v1861_v59  ;;  %v4491_v58 = vor.u32 %v5540_v56, %v4488_v57  ;;  %v5544_v51 = vld [vmem:[%s7241_s7 + $0x13c] sm:$0xf] }
 0x3fa   :  { %v4520_v52 = vld [vmem:[%s7241_s7 + $0x178] sm:$0xf0] }
 0x3fb   :  { %4423 = vmatmul.msk.f32.vlgmr.msra.gmra.mxu1 %vm61_vm0, %v1865_v60  ;;  %v4523_v56 = vor.u32 %v5544_v51, %v4520_v52  ;;  %v5592_v57 = vld [vmem:[%s7243_s9 + $0x4b8] sm:$0xff]  ;;  %v5603_v51 = vld [vmem:[%s7243_s9 + $0x510] sm:$0xff] }
 0x3fc   :  { %2265 = vmatpush.bf16.msra.mxu1 %v4555_v47  ;;  %2253 = vmatpush.bf16.msra.mxu0 %v4487_v55  ;;  %v5543_v47 = vld [vmem:[%s7241_s7 + $0x134] sm:$0xf]  ;;  %v4519_v55 = vor.u32 %v5552_v50, %v4518_v49  ;;  %v5620_v26 = vld [vmem:[%s7243_s9 + $0x598] sm:$0xff]  ;;  %v5618_v49 = vld [vmem:[%s7243_s9 + $0x588] sm:$0xff] }
 0x3fd   :  { %v4515_v54 = vor.u32 %v5543_v47, %v4512_v48  ;;  %v5628_v44 = vld [vmem:[%s7243_s9 + $0x5d8] sm:$0xff]  ;;  %v5626_v50 = vld [vmem:[%s7243_s9 + $0x5c8] sm:$0xff]  ;;  %v5611_v52 = vld [vmem:[%s7243_s9 + $0x550] sm:$0xff] }
 0x3fe   :  { %v5604_v47 = vld [vmem:[%s7243_s9 + $0x518] sm:$0xff] }
 0x3ff   :  { %v5612_v48 = vld [vmem:[%s7243_s9 + $0x558] sm:$0xff] }
 0x400   :  { %2266 = vmatpush.bf16.msra.mxu1 %v4491_v58  ;;  %v5600_v58 = vld [vmem:[%s7243_s9 + $0x4f8] sm:$0xff] }
 0x478   :  { %v1896_v62 = vpop.f32.mrf.mxu1 }
 0x479   :  { %v1897_v63 = vadd.f32 %v5705_v61, %v1896_v62 }
 0x47b   :  { %v1899_v0 = vadd.f32 %v1897_v63, %v1865_v60 }
 0x47d   :  { %v1904_v1 = vsel %vm61_vm0, %v1899_v0, 0.0 }
 0x47e   :  { %1905 = vadd.xlane.f32.xlu2 %v1904_v1  ;;  %v5706_v1 = vld [vmem:[%s7237_s3 + $0x1] ss:$0 sm:$0xff] }
 0x4f1   :  { %v1906_v2 = vpop.xlane.xlu2 %1905 }
 0x4f2   :  { %v1907_v3 = vmul.f32 %v1906_v2, %v5851_v16 }
 0x4f4   :  { %v6539_v4 = vsub.f32 %v1899_v0, %v1907_v3  ;;  %v5707_v3 = vld [vmem:[%s7238_s4 + $0x1] ss:$0 sm:$0xff] }
 0x4f6   :  { %v1909_v5 = vmul.f32 %v6539_v4, %v6539_v4 }
 0x4f8   :  { %v1910_v6 = vsel %vm61_vm0, %v1909_v5, 0.0 }
 0x4f9   :  { %1911 = vadd.xlane.f32.xlu2 %v1910_v6 }
 0x56c   :  { %v1912_v34 = vpop.xlane.xlu2 %1911 }
 0x56d   :  { %v1913_v38 = vmul.f32 %v1912_v34, %v5851_v16  ;;  %v4507_v34 = vor.u32 %v5542_v29, %v4504_v31  ;;  %v5569_v29 = vld [vmem:[%s7243_s9 + $0x400] sm:$0xff] }
 0x56e   :  { %v5577_v31 = vld [vmem:[%s7243_s9 + $0x440] sm:$0xff] }
 0x56f   :  { %v1914_v46 = vadd.f32 1e-05, %v1913_v38  ;;  %v4576_v38 = vld [vmem:[%s7241_s7 + $0x1f0] sm:$0xf0] }
 0x570   :  { %v4579_v43 = vor.u32 %v5559_v37, %v4576_v38  ;;  %v5622_v37 = vld [vmem:[%s7243_s9 + $0x5a8] sm:$0xff] }
 0x571   :  { %5719 = vrsqrt.f32 %v1914_v46  ;;  %vm1921_vm9 = vweird.f32 %v1914_v46  ;;  %v5630_v38 = vld [vmem:[%s7243_s9 + $0x5e8] sm:$0xff] }
 0x577   :  { %v5720_v59 = vpop.eup %5719 }
 0x578   :  { %v1916_v60 = vmul.f32 %v5720_v59, %v1914_v46  ;;  %vm1922_vm8 = vweird.f32 %v5720_v59  ;;  %v4587_v46 = vor.u32 %v5560_v40, %v4584_v41  ;;  %v5621_v40 = vld [vmem:[%s7243_s9 + $0x5a0] sm:$0xff] }
 0x579   :  { %vm1923_vm10 = vmor %vm1921_vm9, %vm1922_vm8  ;;  %v5629_v41 = vld [vmem:[%s7243_s9 + $0x5e0] sm:$0xff] }
 0x57a   :  { %v1917_v61 = vmul.f32 %v5720_v59, %v1916_v60  ;;  %v5584_v60 = vld [vmem:[%s7243_s9 + $0x478] sm:$0xff] }
 0x57c   :  { %v1918_v62 = vmul.f32 0.5, %v1917_v61  ;;  %v5591_v61 = vld [vmem:[%s7243_s9 + $0x4b0] sm:$0xff] }
 0x57e   :  { %v1919_v63 = vsub.f32 1.5, %v1918_v62  ;;  %v5599_v62 = vld [vmem:[%s7243_s9 + $0x4f0] sm:$0xff] }
 0x580   :  { %v1920_v0 = vmul.f32 %v5720_v59, %v1919_v63  ;;  %v5575_v63 = vld [vmem:[%s7243_s9 + $0x430] sm:$0xff] }
 0x582   :  { %v1924_v2 = vsel %vm1923_vm10, %v5720_v59, %v1920_v0  ;;  %v5576_v59 = vld [vmem:[%s7243_s9 + $0x438] sm:$0xff]  ;;  %v5583_v0 = vld [vmem:[%s7243_s9 + $0x470] sm:$0xff] }
 0x583   :  { %v1925_v5 = vmul.f32 %v1924_v2, %v6539_v4  ;;  %v4566_v4 = vld [vmem:[%s7241_s7 + $0x1a8] sm:$0xf] }
 0x584   :  { %v4567_v23 = vor.u32 %v5566_v12, %v4566_v4  ;;  %v5598_v2 = vld [vmem:[%s7243_s9 + $0x4e8] sm:$0xff]  ;;  %v5596_v4 = vld [vmem:[%s7243_s9 + $0x4d8] sm:$0xff] }
 0x585   :  { %v1929_v6 = vmul.f32 %v5706_v1, %v1925_v5  ;;  %v5590_v1 = vld [vmem:[%s7243_s9 + $0x4a8] sm:$0xff]  ;;  %v5572_v12 = vld [vmem:[%s7243_s9 + $0x418] sm:$0xff] }
 0x586   :  { %v5582_v5 = vld [vmem:[%s7243_s9 + $0x468] sm:$0xff] }
 0x587   :  { %v6663_v11 = vadd.f32 %v5707_v3, %v1929_v6  ;;  %v5574_v3 = vld [vmem:[%s7243_s9 + $0x428] sm:$0xff]  ;;  %v5589_v6 = vld [vmem:[%s7243_s9 + $0x4a0] sm:$0xff] }
 0x589   :  { %v6676_v17 = vpack.c.bf16 %v6663_v11, %v6663_v11 }
 0x58b   :  { %4588 = vmatmul.msk.bf16.vlgmr.msra.gmra.mxu2 %vm61_vm0, %v6676_v17  ;;  %4589 = vmatmul.msk.bf16.vlgmr.msra.gmra.mxu3 %vm61_vm0, %v6676_v17 }
 0x58c   :  { %4590 = vmatmul.msk.bf16.vlgmr.msrb.gmra.mxu0 %vm61_vm0, %v6676_v17  ;;  %4591 = vmatmul.msk.bf16.vlgmr.msrb.gmra.mxu1 %vm61_vm0, %v6676_v17 }
 0x58d   :  { %2278 = vmatpush.bf16.msra.mxu2 %v4559_v18  ;;  %2291 = vmatpush.bf16.msra.mxu3 %v4563_v20  ;;  %v5595_v18 = vld [vmem:[%s7243_s9 + $0x4d0] sm:$0xff] }
 0x58e   :  { %2304 = vmatpush.bf16.msrb.mxu0 %v4567_v23  ;;  %2317 = vmatpush.bf16.msrb.mxu1 %v4571_v24  ;;  %v5571_v20 = vld [vmem:[%s7243_s9 + $0x410] sm:$0xff]  ;;  %v5570_v23 = vld [vmem:[%s7243_s9 + $0x408] sm:$0xff] }
 0x58f   :  { %v5578_v24 = vld [vmem:[%s7243_s9 + $0x448] sm:$0xff] }
 0x591   :  { %2279 = vmatpush.bf16.msra.mxu2 %v4495_v32  ;;  %2292 = vmatpush.bf16.msra.mxu3 %v4499_v30  ;;  %v5608_v32 = vld [vmem:[%s7243_s9 + $0x538] sm:$0xff] }
 0x592   :  { %2305 = vmatpush.bf16.msrb.mxu0 %v4503_v33  ;;  %2318 = vmatpush.bf16.msrb.mxu1 %v4507_v34  ;;  %v5616_v30 = vld [vmem:[%s7243_s9 + $0x578] sm:$0xff]  ;;  %v5623_v33 = vld [vmem:[%s7243_s9 + $0x5b0] sm:$0xff] }
 0x593   :  { %v5631_v34 = vld [vmem:[%s7243_s9 + $0x5f0] sm:$0xff] }
 0x59b   :  { %4592 = vmatmul.msk.bf16.vlgmr.msrb.gmra.mxu2 %vm61_vm0, %v6676_v17  ;;  %4593 = vmatmul.msk.bf16.vlgmr.msrb.gmra.mxu3 %vm61_vm0, %v6676_v17 }
 0x59c   :  { %4594 = vmatmul.msk.bf16.vlgmr.msra.gmra.mxu0 %vm61_vm0, %v6676_v17  ;;  %4595 = vmatmul.msk.bf16.vlgmr.msra.gmra.mxu1 %vm61_vm0, %v6676_v17 }
 0x59d   :  { %2330 = vmatpush.bf16.msrb.mxu2 %v4575_v42  ;;  %2343 = vmatpush.bf16.msrb.mxu3 %v4579_v43  ;;  %v5605_v42 = vld [vmem:[%s7243_s9 + $0x520] sm:$0xff] }
 0x59e   :  { %2356 = vmatpush.bf16.msra.mxu0 %v4583_v45  ;;  %2369 = vmatpush.bf16.msra.mxu1 %v4587_v46  ;;  %v5613_v43 = vld [vmem:[%s7243_s9 + $0x560] sm:$0xff]  ;;  %v5619_v45 = vld [vmem:[%s7243_s9 + $0x590] sm:$0xff] }
 0x59f   :  { %v5627_v46 = vld [vmem:[%s7243_s9 + $0x5d0] sm:$0xff] }
 0x5a1   :  { %2331 = vmatpush.bf16.msrb.mxu2 %v4511_v53  ;;  %2344 = vmatpush.bf16.msrb.mxu3 %v4515_v54  ;;  %v5617_v53 = vld [vmem:[%s7243_s9 + $0x580] sm:$0xff] }
 0x5a2   :  { %2357 = vmatpush.bf16.msra.mxu0 %v4519_v55  ;;  %2370 = vmatpush.bf16.msra.mxu1 %v4523_v56  ;;  %v5625_v54 = vld [vmem:[%s7243_s9 + $0x5c0] sm:$0xff]  ;;  %v5602_v55 = vld [vmem:[%s7243_s9 + $0x508] sm:$0xff] }
 0x5a3   :  { %v5610_v56 = vld [vmem:[%s7243_s9 + $0x548] sm:$0xff] }
 0x5ab   :  { %4596 = vmatmul.msk.bf16.vlgmr.msra.gmra.mxu2 %vm61_vm0, %v6676_v17  ;;  %4597 = vmatmul.msk.bf16.vlgmr.msra.gmra.mxu3 %vm61_vm0, %v6676_v17 }
 0x5ac   :  { %4598 = vmatmul.msk.bf16.vlgmr.msrb.gmra.mxu0 %vm61_vm0, %v6676_v17  ;;  %4599 = vmatmul.msk.bf16.vlgmr.msrb.gmra.mxu1 %vm61_vm0, %v6676_v17 }
 0x5ad   :  { %3464 = vmatpush.bf16.msrb.mxu0 %v5592_v57  ;;  %3477 = vmatpush.bf16.msrb.mxu1 %v5600_v58  ;;  %v5601_v57 = vld [vmem:[%s7243_s9 + $0x500] sm:$0xff] }
 0x5ae   :  { %3438 = vmatpush.bf16.msra.mxu2 %v5576_v59  ;;  %3451 = vmatpush.bf16.msra.mxu3 %v5584_v60  ;;  %v5609_v58 = vld [vmem:[%s7243_s9 + $0x540] sm:$0xff]  ;;  %v6977_v59 = vld [vmem:[%s7242_s8 + $0x10] sm:$0xff] }
 0x5af   :  { %v1975_v60 = vperm.slane %v6977_v59, 2 }
 0x5b1   :  { %3465 = vmatpush.bf16.msrb.mxu0 %v5591_v61  ;;  %3478 = vmatpush.bf16.msrb.mxu1 %v5599_v62  ;;  %v1976_v61 = vperm.slane %v6977_v59, 3 }
 0x5b2   :  { %3439 = vmatpush.bf16.msra.mxu2 %v5575_v63  ;;  %3452 = vmatpush.bf16.msra.mxu3 %v5583_v0 }
 0x5b5   :  { %3466 = vmatpush.bf16.msrb.mxu0 %v5590_v1  ;;  %3479 = vmatpush.bf16.msrb.mxu1 %v5598_v2  ;;  %v1973_v2 = vperm.slane %v6977_v59, 0 }
 0x5b6   :  { %3440 = vmatpush.bf16.msra.mxu2 %v5574_v3  ;;  %3453 = vmatpush.bf16.msra.mxu3 %v5582_v5  ;;  %v1974_v3 = vperm.slane %v6977_v59, 1 }
 0x5b9   :  { %3467 = vmatpush.bf16.msrb.mxu0 %v5589_v6  ;;  %3480 = vmatpush.bf16.msrb.mxu1 %v5597_v7  ;;  %v5656_v7 = vld [vmem:[%s7243_s9 + $0x6b8] sm:$0xff] }
 0x5ba   :  { %3441 = vmatpush.bf16.msra.mxu2 %v5573_v8  ;;  %3454 = vmatpush.bf16.msra.mxu3 %v5581_v9  ;;  %v5664_v8 = vld [vmem:[%s7243_s9 + $0x6f8] sm:$0xff] }
 0x5bb   :  { %4600 = vmatmul.msk.bf16.vlgmr.msrb.gmra.mxu2 %vm61_vm0, %v6676_v17  ;;  %4601 = vmatmul.msk.bf16.vlgmr.msrb.gmra.mxu3 %vm61_vm0, %v6676_v17 }
 0x5bc   :  { %4602 = vmatmul.msk.bf16.vlgmr.msra.gmra.mxu0 %vm61_vm0, %v6676_v17  ;;  %4603 = vmatmul.msk.bf16.vlgmr.msra.gmra.mxu1 %vm61_vm0, %v6676_v17  ;;  %v5579_v17 = vld [vmem:[%s7243_s9 + $0x450] sm:$0xff] }
 0x5bd   :  { %3468 = vmatpush.bf16.msrb.mxu0 %v5588_v10  ;;  %3481 = vmatpush.bf16.msrb.mxu1 %v5596_v4 }
 0x5be   :  { %3442 = vmatpush.bf16.msra.mxu2 %v5572_v12  ;;  %3455 = vmatpush.bf16.msra.mxu3 %v5580_v14 }
 0x5c1   :  { %3469 = vmatpush.bf16.msrb.mxu0 %v5587_v15  ;;  %3482 = vmatpush.bf16.msrb.mxu1 %v5595_v18 }
 0x5c2   :  { %3443 = vmatpush.bf16.msra.mxu2 %v5571_v20  ;;  %3456 = vmatpush.bf16.msra.mxu3 %v5579_v17 }
 0x5c5   :  { %3470 = vmatpush.bf16.msrb.mxu0 %v5586_v21  ;;  %3483 = vmatpush.bf16.msrb.mxu1 %v5594_v22  ;;  %v5655_v22 = vld [vmem:[%s7243_s9 + $0x6b0] sm:$0xff] }
 0x5c6   :  { %3444 = vmatpush.bf16.msra.mxu2 %v5570_v23  ;;  %3457 = vmatpush.bf16.msra.mxu3 %v5578_v24  ;;  %v5663_v23 = vld [vmem:[%s7243_s9 + $0x6f0] sm:$0xff] }
 0x5c9   :  { %3471 = vmatpush.bf16.msrb.mxu0 %v5585_v25  ;;  %3484 = vmatpush.bf16.msrb.mxu1 %v5593_v19  ;;  %v5640_v19 = vld [vmem:[%s7243_s9 + $0x638] sm:$0xff] }
 0x5ca   :  { %3445 = vmatpush.bf16.msra.mxu2 %v5569_v29  ;;  %3458 = vmatpush.bf16.msra.mxu3 %v5577_v31  ;;  %v5662_v29 = vld [vmem:[%s7243_s9 + $0x6e8] sm:$0xff] }
 0x5cd   :  { %3516 = vmatpush.bf16.msra.mxu0 %v5624_v27  ;;  %3529 = vmatpush.bf16.msra.mxu1 %v5632_v28  ;;  %v5648_v27 = vld [vmem:[%s7243_s9 + $0x678] sm:$0xff]  ;;  %v5654_v28 = vld [vmem:[%s7243_s9 + $0x6a8] sm:$0xff] }
 0x5ce   :  { %3490 = vmatpush.bf16.msrb.mxu2 %v5608_v32  ;;  %3503 = vmatpush.bf16.msrb.mxu3 %v5616_v30  ;;  %v1979_v30 = vperm.slane %v6977_v59, 6 }
 0x5d1   :  { %3517 = vmatpush.bf16.msra.mxu0 %v5623_v33  ;;  %3530 = vmatpush.bf16.msra.mxu1 %v5631_v34  ;;  %v1980_v33 = vperm.slane %v6977_v59, 7  ;;  %v5639_v34 = vld [vmem:[%s7243_s9 + $0x630] sm:$0xff] }
 0x5d2   :  { %3491 = vmatpush.bf16.msrb.mxu2 %v5607_v35  ;;  %3504 = vmatpush.bf16.msrb.mxu3 %v5615_v36  ;;  %v5647_v35 = vld [vmem:[%s7243_s9 + $0x670] sm:$0xff] }
 0x5d5   :  { %3518 = vmatpush.bf16.msra.mxu0 %v5622_v37  ;;  %3531 = vmatpush.bf16.msra.mxu1 %v5630_v38  ;;  %v5653_v38 = vld [vmem:[%s7243_s9 + $0x6a0] sm:$0xff] }
 0x5d6   :  { %3492 = vmatpush.bf16.msrb.mxu2 %v5606_v13  ;;  %3505 = vmatpush.bf16.msrb.mxu3 %v5614_v39  ;;  %v5661_v13 = vld [vmem:[%s7243_s9 + $0x6e0] sm:$0xff] }
 0x5d9   :  { %3519 = vmatpush.bf16.msra.mxu0 %v5621_v40  ;;  %3532 = vmatpush.bf16.msra.mxu1 %v5629_v41  ;;  %v5638_v41 = vld [vmem:[%s7243_s9 + $0x628] sm:$0xff] }
 0x5da   :  { %3493 = vmatpush.bf16.msrb.mxu2 %v5605_v42  ;;  %3506 = vmatpush.bf16.msrb.mxu3 %v5613_v43  ;;  %v5646_v42 = vld [vmem:[%s7243_s9 + $0x668] sm:$0xff]  ;;  %v1977_v43 = vperm.slane %v6977_v59, 4 }
 0x5dd   :  { %3520 = vmatpush.bf16.msra.mxu0 %v5620_v26  ;;  %3533 = vmatpush.bf16.msra.mxu1 %v5628_v44  ;;  %v1978_v26 = vperm.slane %v6977_v59, 5 }
 0x5de   :  { %3494 = vmatpush.bf16.msrb.mxu2 %v5604_v47  ;;  %3507 = vmatpush.bf16.msrb.mxu3 %v5612_v48  ;;  %v5660_v47 = vld [vmem:[%s7243_s9 + $0x6d8] sm:$0xff] }
 0x5e1   :  { %3521 = vmatpush.bf16.msra.mxu0 %v5619_v45  ;;  %3534 = vmatpush.bf16.msra.mxu1 %v5627_v46  ;;  %v5652_v46 = vld [vmem:[%s7243_s9 + $0x698] sm:$0xff] }
 0x5e2   :  { %3495 = vmatpush.bf16.msrb.mxu2 %v5603_v51  ;;  %3508 = vmatpush.bf16.msrb.mxu3 %v5611_v52 }
 0x5e5   :  { %3522 = vmatpush.bf16.msra.mxu0 %v5618_v49  ;;  %3535 = vmatpush.bf16.msra.mxu1 %v5626_v50 }
 0x5e6   :  { %3496 = vmatpush.bf16.msrb.mxu2 %v5602_v55  ;;  %3509 = vmatpush.bf16.msrb.mxu3 %v5610_v56  ;;  %v5645_v55 = vld [vmem:[%s7243_s9 + $0x660] sm:$0xff] }
 0x5e9   :  { %3523 = vmatpush.bf16.msra.mxu0 %v5617_v53  ;;  %3536 = vmatpush.bf16.msra.mxu1 %v5625_v54  ;;  %v5637_v54 = vld [vmem:[%s7243_s9 + $0x620] sm:$0xff] }
 0x5ea   :  { %3497 = vmatpush.bf16.msrb.mxu2 %v5601_v57  ;;  %3510 = vmatpush.bf16.msrb.mxu3 %v5609_v58 }
 0x609   :  { %v2203_v62 = vpop.f32.mrf.mxu0  ;;  %v2216_v63 = vpop.f32.mrf.mxu1 }
 0x60a   :  { %v2204_v0 = vadd.f32 %v2203_v62, %v1975_v60  ;;  %v2217_v1 = vadd.f32 %v2216_v63, %v1976_v61  ;;  %v5651_v60 = vld [vmem:[%s7243_s9 + $0x690] sm:$0xff] }
 0x60b   :  { %v5659_v61 = vld [vmem:[%s7243_s9 + $0x6d0] sm:$0xff] }
 0x60c   :  { %v2378_v5 = vmax.f32 %v2204_v0, 0.0  ;;  %v2379_v6 = vmax.f32 %v2217_v1, 0.0  ;;  %v5636_v0 = vld [vmem:[%s7243_s9 + $0x618] sm:$0xff] }
 0x60d   :  { %v5644_v1 = vld [vmem:[%s7243_s9 + $0x658] sm:$0xff] }
 0x60e   :  { %v2394_v9 = vpack.c.bf16 %v2378_v5, %v2378_v5  ;;  %v2395_v10 = vpack.c.bf16 %v2379_v6, %v2379_v6  ;;  %v2177_v4 = vpop.f32.mrf.mxu2  ;;  %v2190_v12 = vpop.f32.mrf.mxu3  ;;  %v5658_v5 = vld [vmem:[%s7243_s9 + $0x6c8] sm:$0xff] }
 0x60f   :  { %v2178_v14 = vadd.f32 %v2177_v4, %v1973_v2  ;;  %v2191_v15 = vadd.f32 %v2190_v12, %v1974_v3  ;;  %v7056_v2 = vld [vmem:[%s7242_s8 + $0x18] sm:$0xff]  ;;  %v5650_v3 = vld [vmem:[%s7243_s9 + $0x688] sm:$0xff]  ;;  %v5643_v4 = vld [vmem:[%s7243_s9 + $0x650] sm:$0xff] }
 0x610   :  { %3472 = vmatmul.bf16.vlgmr.msrb.gmra.mxu0 %v2394_v9  ;;  %3485 = vmatmul.bf16.vlgmr.msrb.gmra.mxu1 %v2395_v10  ;;  %v1984_v9 = vperm.slane %v7056_v2, 3  ;;  %v5635_v10 = vld [vmem:[%s7243_s9 + $0x610] sm:$0xff] }
 0x611   :  { %v2376_v18 = vmax.f32 %v2178_v14, 0.0  ;;  %v2377_v20 = vmax.f32 %v2191_v15, 0.0  ;;  %3568 = vmatpush.bf16.msrb.mxu0 %v5656_v7  ;;  %3581 = vmatpush.bf16.msrb.mxu1 %v5664_v8  ;;  %v2205_v17 = vpop.f32.mrf.mxu0  ;;  %v2218_v21 = vpop.f32.mrf.mxu1  ;;  %v1983_v8 = vperm.slane %v7056_v2, 2  ;;  %v5649_v15 = vld [vmem:[%s7243_s9 + $0x680] sm:$0xff] }
 0x612   :  { %v5688_v21 = vld [vmem:[%s7243_s9 + $0x7b8] sm:$0xff] }
 0x613   :  { %v2392_v24 = vpack.c.bf16 %v2376_v18, %v2376_v18  ;;  %v2393_v25 = vpack.c.bf16 %v2377_v20, %v2377_v20  ;;  %v5657_v18 = vld [vmem:[%s7243_s9 + $0x6c0] sm:$0xff] }
 0x615   :  { %3569 = vmatpush.bf16.msrb.mxu0 %v5655_v22  ;;  %3582 = vmatpush.bf16.msrb.mxu1 %v5663_v23  ;;  %v5696_v22 = vld [vmem:[%s7243_s9 + $0x7f8] sm:$0xff]  ;;  %v5634_v23 = vld [vmem:[%s7243_s9 + $0x608] sm:$0xff] }
 0x616   :  { %3446 = vmatmul.bf16.vlgmr.msra.gmra.mxu2 %v2392_v24  ;;  %3459 = vmatmul.bf16.vlgmr.msra.gmra.mxu3 %v2393_v25  ;;  %v2179_v31 = vpop.f32.mrf.mxu2  ;;  %v2192_v32 = vpop.f32.mrf.mxu3  ;;  %v5642_v24 = vld [vmem:[%s7243_s9 + $0x648] sm:$0xff]  ;;  %v1981_v25 = vperm.slane %v7056_v2, 0 }
 0x617   :  { %3542 = vmatpush.bf16.msra.mxu2 %v5640_v19  ;;  %3555 = vmatpush.bf16.msra.mxu3 %v5648_v27  ;;  %v1982_v19 = vperm.slane %v7056_v2, 1 }
 0x619   :  { %3570 = vmatpush.bf16.msrb.mxu0 %v5654_v28  ;;  %3583 = vmatpush.bf16.msrb.mxu1 %v5662_v29  ;;  %v2255_v36 = vpop.f32.mrf.mxu0  ;;  %v2268_v37 = vpop.f32.mrf.mxu1 }
 0x61a   :  { %v2256_v39 = vadd.f32 %v2255_v36, %v1979_v30  ;;  %v2269_v40 = vadd.f32 %v2268_v37, %v1980_v33  ;;  %v5687_v33 = vld [vmem:[%s7243_s9 + $0x7b0] sm:$0xff]  ;;  %v5633_v37 = vld [vmem:[%s7243_s9 + $0x600] sm:$0xff] }
 0x61b   :  { %3543 = vmatpush.bf16.msra.mxu2 %v5639_v34  ;;  %3556 = vmatpush.bf16.msra.mxu3 %v5647_v35  ;;  %v5695_v34 = vld [vmem:[%s7243_s9 + $0x7f0] sm:$0xff] }
 0x61c   :  { %v2382_v44 = vmax.f32 %v2256_v39, 0.0  ;;  %v2383_v45 = vmax.f32 %v2269_v40, 0.0  ;;  %v5680_v39 = vld [vmem:[%s7243_s9 + $0x778] sm:$0xff] }
 0x61d   :  { %3571 = vmatpush.bf16.msrb.mxu0 %v5653_v38  ;;  %3584 = vmatpush.bf16.msrb.mxu1 %v5661_v13  ;;  %v5641_v38 = vld [vmem:[%s7243_s9 + $0x640] sm:$0xff]  ;;  %v5672_v13 = vld [vmem:[%s7243_s9 + $0x738] sm:$0xff] }
 0x61e   :  { %v2398_v48 = vpack.c.bf16 %v2382_v44, %v2382_v44  ;;  %v2399_v49 = vpack.c.bf16 %v2383_v45, %v2383_v45  ;;  %v2229_v50 = vpop.f32.mrf.mxu2  ;;  %v2242_v51 = vpop.f32.mrf.mxu3  ;;  %v5694_v44 = vld [vmem:[%s7243_s9 + $0x7e8] sm:$0xff] }
 0x61f   :  { %3544 = vmatpush.bf16.msra.mxu2 %v5638_v41  ;;  %3557 = vmatpush.bf16.msra.mxu3 %v5646_v42  ;;  %v2230_v52 = vadd.f32 %v2229_v50, %v1977_v43  ;;  %v2243_v53 = vadd.f32 %v2242_v51, %v1978_v26  ;;  %v5686_v26 = vld [vmem:[%s7243_s9 + $0x7a8] sm:$0xff]  ;;  %v5685_v51 = vld [vmem:[%s7243_s9 + $0x7a0] sm:$0xff] }
 0x620   :  { %3524 = vmatmul.bf16.vlgmr.msra.gmra.mxu0 %v2398_v48  ;;  %3537 = vmatmul.bf16.vlgmr.msra.gmra.mxu1 %v2399_v49  ;;  %v5679_v48 = vld [vmem:[%s7243_s9 + $0x770] sm:$0xff] }
 0x621   :  { %v2380_v56 = vmax.f32 %v2230_v52, 0.0  ;;  %v2381_v57 = vmax.f32 %v2243_v53, 0.0  ;;  %3572 = vmatpush.bf16.msrb.mxu0 %v5652_v46  ;;  %3585 = vmatpush.bf16.msrb.mxu1 %v5660_v47  ;;  %v2257_v58 = vpop.f32.mrf.mxu0  ;;  %v2270_v59 = vpop.f32.mrf.mxu1  ;;  %v5671_v47 = vld [vmem:[%s7243_s9 + $0x730] sm:$0xff]  ;;  %v5693_v52 = vld [vmem:[%s7243_s9 + $0x7e0] sm:$0xff]  ;;  %v5670_v53 = vld [vmem:[%s7243_s9 + $0x728] sm:$0xff] }
 0x622   :  { %v5692_v58 = vld [vmem:[%s7243_s9 + $0x7d8] sm:$0xff]  ;;  %v5669_v59 = vld [vmem:[%s7243_s9 + $0x720] sm:$0xff] }
 0x623   :  { %v2396_v62 = vpack.c.bf16 %v2380_v56, %v2380_v56  ;;  %v2397_v63 = vpack.c.bf16 %v2381_v57, %v2381_v57  ;;  %3545 = vmatpush.bf16.msra.mxu2 %v5637_v54  ;;  %3558 = vmatpush.bf16.msra.mxu3 %v5645_v55  ;;  %v5678_v54 = vld [vmem:[%s7243_s9 + $0x768] sm:$0xff]  ;;  %v5684_v57 = vld [vmem:[%s7243_s9 + $0x798] sm:$0xff] }
 0x625   :  { %3573 = vmatpush.bf16.msrb.mxu0 %v5651_v60  ;;  %3586 = vmatpush.bf16.msrb.mxu1 %v5659_v61  ;;  %v5677_v60 = vld [vmem:[%s7243_s9 + $0x760] sm:$0xff] }
 0x626   :  { %3498 = vmatmul.bf16.vlgmr.msrb.gmra.mxu2 %v2396_v62  ;;  %3511 = vmatmul.bf16.vlgmr.msrb.gmra.mxu3 %v2397_v63  ;;  %v2231_v6 = vpop.f32.mrf.mxu2  ;;  %v2244_v7 = vpop.f32.mrf.mxu3  ;;  %v5683_v63 = vld [vmem:[%s7243_s9 + $0x790] sm:$0xff] }
 0x627   :  { %3546 = vmatpush.bf16.msra.mxu2 %v5636_v0  ;;  %3559 = vmatpush.bf16.msra.mxu3 %v5644_v1  ;;  %v5691_v0 = vld [vmem:[%s7243_s9 + $0x7d0] sm:$0xff]  ;;  %v1987_v1 = vperm.slane %v7056_v2, 6  ;;  %v5676_v6 = vld [vmem:[%s7243_s9 + $0x758] sm:$0xff] }
 0x629   :  { %3574 = vmatpush.bf16.msrb.mxu0 %v5650_v3  ;;  %3587 = vmatpush.bf16.msrb.mxu1 %v5658_v5  ;;  %v2307_v12 = vpop.f32.mrf.mxu0  ;;  %v2320_v14 = vpop.f32.mrf.mxu1  ;;  %v1988_v3 = vperm.slane %v7056_v2, 7  ;;  %v5668_v5 = vld [vmem:[%s7243_s9 + $0x718] sm:$0xff] }
 0x62a   :  { %v2308_v20 = vadd.f32 %v2307_v12, %v1983_v8  ;;  %v2321_v17 = vadd.f32 %v2320_v14, %v1984_v9  ;;  %v5682_v9 = vld [vmem:[%s7243_s9 + $0x788] sm:$0xff]  ;;  %v5667_v14 = vld [vmem:[%s7243_s9 + $0x710] sm:$0xff] }
 0x62b   :  { %3547 = vmatpush.bf16.msra.mxu2 %v5635_v10  ;;  %3560 = vmatpush.bf16.msra.mxu3 %v5643_v4  ;;  %v5690_v10 = vld [vmem:[%s7243_s9 + $0x7c8] sm:$0xff] }
 0x62c   :  { %v2386_v27 = vmax.f32 %v2308_v20, 0.0  ;;  %v2387_v28 = vmax.f32 %v2321_v17, 0.0  ;;  %v1986_v20 = vperm.slane %v7056_v2, 5 }
 0x62d   :  { %3575 = vmatpush.bf16.msrb.mxu0 %v5649_v15  ;;  %3588 = vmatpush.bf16.msrb.mxu1 %v5657_v18  ;;  %v5675_v15 = vld [vmem:[%s7243_s9 + $0x750] sm:$0xff]  ;;  %v1985_v18 = vperm.slane %v7056_v2, 4  ;;  %v5666_v2 = vld [vmem:[%s7243_s9 + $0x708] sm:$0xff] }
 0x62e   :  { %v2402_v29 = vpack.c.bf16 %v2386_v27, %v2386_v27  ;;  %v2403_v31 = vpack.c.bf16 %v2387_v28, %v2387_v28  ;;  %v2281_v32 = vpop.f32.mrf.mxu2  ;;  %v2294_v30 = vpop.f32.mrf.mxu3 }
 0x62f   :  { %3548 = vmatpush.bf16.msra.mxu2 %v5634_v23  ;;  %3561 = vmatpush.bf16.msra.mxu3 %v5642_v24  ;;  %v2282_v35 = vadd.f32 %v2281_v32, %v1981_v25  ;;  %v2295_v36 = vadd.f32 %v2294_v30, %v1982_v19  ;;  %v5689_v23 = vld [vmem:[%s7243_s9 + $0x7c0] sm:$0xff]  ;;  %v5674_v19 = vld [vmem:[%s7243_s9 + $0x748] sm:$0xff] }
 0x630   :  { %3576 = vmatmul.bf16.vlgmr.msrb.gmra.mxu0 %v2402_v29  ;;  %3589 = vmatmul.bf16.vlgmr.msrb.gmra.mxu1 %v2403_v31  ;;  %v5665_v32 = vld [vmem:[%s7243_s9 + $0x700] sm:$0xff] }
 0x631   :  { %3620 = vmatpush.bf16.msra.mxu0 %v5688_v21  ;;  %3633 = vmatpush.bf16.msra.mxu1 %v5696_v22  ;;  %v2384_v40 = vmax.f32 %v2282_v35, 0.0  ;;  %v2385_v41 = vmax.f32 %v2295_v36, 0.0  ;;  %v2309_v42 = vpop.f32.mrf.mxu0  ;;  %v2322_v43 = vpop.f32.mrf.mxu1  ;;  %v5681_v22 = vld [vmem:[%s7243_s9 + $0x780] sm:$0xff] }
 0x632   :  { %v5673_v30 = vld [vmem:[%s7243_s9 + $0x740] sm:$0xff] }
 0x633   :  { %v2400_v45 = vpack.c.bf16 %v2384_v40, %v2384_v40  ;;  %v2401_v46 = vpack.c.bf16 %v2385_v41, %v2385_v41  ;;  %3549 = vmatpush.bf16.msra.mxu2 %v5633_v37  ;;  %3562 = vmatpush.bf16.msra.mxu3 %v5641_v38 }
 0x635   :  { %3621 = vmatpush.bf16.msra.mxu0 %v5687_v33  ;;  %3634 = vmatpush.bf16.msra.mxu1 %v5695_v34 }
 0x636   :  { %v2283_v49 = vpop.f32.mrf.mxu2  ;;  %v2296_v50 = vpop.f32.mrf.mxu3  ;;  %3550 = vmatmul.bf16.vlgmr.msra.gmra.mxu2 %v2400_v45  ;;  %3563 = vmatmul.bf16.vlgmr.msra.gmra.mxu3 %v2401_v46 }
 0x637   :  { %3594 = vmatpush.bf16.msrb.mxu2 %v5672_v13  ;;  %3607 = vmatpush.bf16.msrb.mxu3 %v5680_v39 }
 0x639   :  { %3622 = vmatpush.bf16.msra.mxu0 %v5686_v26  ;;  %3635 = vmatpush.bf16.msra.mxu1 %v5694_v44  ;;  %v2359_v55 = vpop.f32.mrf.mxu0  ;;  %v2372_v56 = vpop.f32.mrf.mxu1 }
 0x63a   :  { %v2360_v4 = vadd.f32 %v2359_v55, %v1987_v1  ;;  %v2373_v12 = vadd.f32 %v2372_v56, %v1988_v3 }
 0x63b   :  { %3595 = vmatpush.bf16.msrb.mxu2 %v5671_v47  ;;  %3608 = vmatpush.bf16.msrb.mxu3 %v5679_v48  ;;  %v5708_v47 = vld [vmem:[%s7244_s10 + $0x1] ss:$0 sm:$0xff] }
 0x63c   :  { %v2390_v24 = vmax.f32 %v2360_v4, 0.0  ;;  %v2391_v25 = vmax.f32 %v2373_v12, 0.0 }
 0x63d   :  { %3623 = vmatpush.bf16.msra.mxu0 %v5685_v51  ;;  %3636 = vmatpush.bf16.msra.mxu1 %v5693_v52 }
 0x63e   :  { %v2333_v61 = vpop.f32.mrf.mxu2  ;;  %v2346_v62 = vpop.f32.mrf.mxu3  ;;  %v2406_v29 = vpack.c.bf16 %v2390_v24, %v2390_v24  ;;  %v2407_v31 = vpack.c.bf16 %v2391_v25, %v2391_v25 }
 0x63f   :  { %3596 = vmatpush.bf16.msrb.mxu2 %v5670_v53  ;;  %3609 = vmatpush.bf16.msrb.mxu3 %v5678_v54  ;;  %v2334_v27 = vadd.f32 %v2333_v61, %v1985_v18  ;;  %v2347_v28 = vadd.f32 %v2346_v62, %v1986_v20 }
 0x641   :  { %3624 = vmatpush.bf16.msra.mxu0 %v5684_v57  ;;  %3637 = vmatpush.bf16.msra.mxu1 %v5692_v58  ;;  %v2361_v7 = vpop.f32.mrf.mxu0  ;;  %v2374_v8 = vpop.f32.mrf.mxu1  ;;  %v2388_v33 = vmax.f32 %v2334_v27, 0.0  ;;  %v2389_v34 = vmax.f32 %v2347_v28, 0.0 }
 0x643   :  { %3597 = vmatpush.bf16.msrb.mxu2 %v5669_v59  ;;  %3610 = vmatpush.bf16.msrb.mxu3 %v5677_v60  ;;  %v2404_v35 = vpack.c.bf16 %v2388_v33, %v2388_v33  ;;  %v2405_v36 = vpack.c.bf16 %v2389_v34, %v2389_v34  ;;  %v3681_v33 = vld [vmem:[%s7245_s11] sm:$0xff]  ;;  %v3714_v34 = vld [vmem:[%s7247_s13 + $0x8] sm:$0xff] }
 0x645   :  { %3625 = vmatpush.bf16.msra.mxu0 %v5683_v63  ;;  %3638 = vmatpush.bf16.msra.mxu1 %v5691_v0 }
 0x646   :  { %v2335_v17 = vpop.f32.mrf.mxu2  ;;  %v2348_v21 = vpop.f32.mrf.mxu3 }
 0x647   :  { %3598 = vmatpush.bf16.msrb.mxu2 %v5668_v5  ;;  %3611 = vmatpush.bf16.msrb.mxu3 %v5676_v6 }
 0x649   :  { %3626 = vmatpush.bf16.msra.mxu0 %v5682_v9  ;;  %3639 = vmatpush.bf16.msra.mxu1 %v5690_v10 }
 0x64b   :  { %3599 = vmatpush.bf16.msrb.mxu2 %v5667_v14  ;;  %3612 = vmatpush.bf16.msrb.mxu3 %v5675_v15 }
 0x64d   :  { %3627 = vmatpush.bf16.msra.mxu0 %v5681_v22  ;;  %3640 = vmatpush.bf16.msra.mxu1 %v5689_v23 }
 0x64f   :  { %3600 = vmatpush.bf16.msrb.mxu2 %v5666_v2  ;;  %3613 = vmatpush.bf16.msrb.mxu3 %v5674_v19 }
 0x650   :  { %3628 = vmatmul.bf16.vlgmr.msra.gmra.mxu0 %v2406_v29  ;;  %3641 = vmatmul.bf16.vlgmr.msra.gmra.mxu1 %v2407_v31 }
 0x653   :  { %3601 = vmatpush.bf16.msrb.mxu2 %v5665_v32  ;;  %3614 = vmatpush.bf16.msrb.mxu3 %v5673_v30  ;;  %v3684_v32 = vld [vmem:[%s7245_s11 + $0x18] sm:$0xff]  ;;  %v3682_v30 = vld [vmem:[%s7245_s11 + $0x8] sm:$0xff] }
 0x656   :  { %3602 = vmatmul.bf16.vlgmr.msrb.gmra.mxu2 %v2404_v35  ;;  %3615 = vmatmul.bf16.vlgmr.msrb.gmra.mxu3 %v2405_v36  ;;  %v3713_v35 = vld [vmem:[%s7247_s13] sm:$0xff] }
 0x657   :  { %3704 = vmatpush.msra.mxu2 %v3684_v32  ;;  %3737 = vmatpush.msra.mxu3 %v3714_v34 }
 0x659   :  { %3738 = vmatpush.msra.mxu3 %v3713_v35 }
 0x68d   :  { %v3473_v37 = vpop.f32.mrf.mxu0  ;;  %v3486_v38 = vpop.f32.mrf.mxu1 }
 0x695   :  { %v3475_v13 = vpop.f32.mrf.mxu0  ;;  %v3488_v39 = vpop.f32.mrf.mxu1 }
 0x699   :  { %v3447_v40 = vpop.f32.mrf.mxu2  ;;  %v3460_v41 = vpop.f32.mrf.mxu3 }
 0x69a   :  { %v3448_v50 = vadd.f32 %v5708_v47, %v3447_v40 }
 0x69c   :  { %v3461_v53 = vadd.f32 %v3460_v41, %v3448_v50 }
 0x69d   :  { %v3525_v42 = vpop.f32.mrf.mxu0  ;;  %v3538_v43 = vpop.f32.mrf.mxu1 }
 0x69e   :  { %v3474_v56 = vadd.f32 %v3473_v37, %v3461_v53 }
 0x6a0   :  { %v3487_v59 = vadd.f32 %v3486_v38, %v3474_v56 }
 0x6a1   :  { %v3449_v26 = vpop.f32.mrf.mxu2  ;;  %v3462_v44 = vpop.f32.mrf.mxu3 }
 0x6a2   :  { %v5709_v26 = vld [vmem:[%s7239_s5 + $0x1] ss:$0 sm:$0xff] }
 0x6a5   :  { %v3527_v45 = vpop.f32.mrf.mxu0  ;;  %v3540_v46 = vpop.f32.mrf.mxu1 }
 0x6a9   :  { %v3499_v48 = vpop.f32.mrf.mxu2  ;;  %v3512_v49 = vpop.f32.mrf.mxu3 }
 0x6aa   :  { %v3500_v62 = vadd.f32 %v3499_v48, %v3487_v59  ;;  %v5711_v48 = vld [vmem:[%s7246_s12] ss:$0 sm:$0xff] }
 0x6ac   :  { %v3513_v63 = vadd.f32 %v3512_v49, %v3500_v62 }
 0x6ad   :  { %v3577_v51 = vpop.f32.mrf.mxu0  ;;  %v3590_v52 = vpop.f32.mrf.mxu1 }
 0x6ae   :  { %v3526_v3 = vadd.f32 %v3525_v42, %v3513_v63 }
 0x6b0   :  { %v3539_v5 = vadd.f32 %v3538_v43, %v3526_v3 }
 0x6b1   :  { %v3501_v54 = vpop.f32.mrf.mxu2  ;;  %v3514_v55 = vpop.f32.mrf.mxu3 }
 0x6b5   :  { %v3579_v57 = vpop.f32.mrf.mxu0  ;;  %v3592_v58 = vpop.f32.mrf.mxu1 }
 0x6b9   :  { %v3551_v60 = vpop.f32.mrf.mxu2  ;;  %v3564_v61 = vpop.f32.mrf.mxu3 }
 0x6ba   :  { %v3552_v6 = vadd.f32 %v3551_v60, %v3539_v5 }
 0x6bc   :  { %v3565_v9 = vadd.f32 %v3564_v61, %v3552_v6 }
 0x6be   :  { %v3578_v10 = vadd.f32 %v3577_v51, %v3565_v9 }
 0x6c0   :  { %v3591_v14 = vadd.f32 %v3590_v52, %v3578_v10  ;;  %v5712_v52 = vld [vmem:[%s7248_s14] ss:$0 sm:$0xff] }
 0x6c1   :  { %v3553_v0 = vpop.f32.mrf.mxu2  ;;  %v3566_v1 = vpop.f32.mrf.mxu3 }
 0x6cd   :  { %v3629_v7 = vpop.f32.mrf.mxu0  ;;  %v3642_v8 = vpop.f32.mrf.mxu1 }
 0x6d5   :  { %v3631_v4 = vpop.f32.mrf.mxu0  ;;  %v3644_v12 = vpop.f32.mrf.mxu1 }
 0x6d9   :  { %v3603_v15 = vpop.f32.mrf.mxu2  ;;  %v3616_v18 = vpop.f32.mrf.mxu3 }
 0x6da   :  { %v3604_v20 = vadd.f32 %v3603_v15, %v3591_v14 }
 0x6dc   :  { %v3617_v17 = vadd.f32 %v3616_v18, %v3604_v20 }
 0x6de   :  { %v3630_v21 = vadd.f32 %v3629_v7, %v3617_v17 }
 0x6e0   :  { %v3643_v22 = vadd.f32 %v3642_v8, %v3630_v21 }
 0x6e1   :  { %v3605_v23 = vpop.f32.mrf.mxu2  ;;  %v3618_v24 = vpop.f32.mrf.mxu3 }
 0x6e2   :  { %v3646_v25 = vadd.f32 %v3643_v22, %v6663_v11  ;;  %v3683_v11 = vld [vmem:[%s7245_s11 + $0x10] sm:$0xff] }
 0x6e3   :  { %3705 = vmatpush.msra.mxu2 %v3683_v11 }
 0x6e4   :  { %v3651_v2 = vsel %vm61_vm0, %v3646_v25, 0.0 }
 0x6e5   :  { %3652 = vadd.xlane.f32.xlu0 %v3651_v2  ;;  %3706 = vmatpush.msra.mxu2 %v3682_v30 }
 0x6e7   :  { %3707 = vmatpush.msra.mxu2 %v3681_v33 }
 0x758   :  { %v3653_v19 = vpop.xlane.xlu0 %3652 }
 0x759   :  { %v3654_v27 = vmul.f32 %v3653_v19, %v5851_v16 }
 0x75b   :  { %v3655_v28 = vsub.f32 %v3646_v25, %v3654_v27 }
 0x75d   :  { %v3656_v29 = vmul.f32 %v3655_v28, %v3655_v28 }
 0x75f   :  { %v3657_v31 = vsel %vm61_vm0, %v3656_v29, 0.0 }
 0x760   :  { %3658 = vadd.xlane.f32.xlu1 %v3657_v31 }
 0x7d3   :  { %v3659_v36 = vpop.xlane.xlu1 %3658 }
 0x7d4   :  { %v3660_v37 = vmul.f32 %v3659_v36, %v5851_v16  ;;  %v5710_v16 = vld [vmem:[%s7240_s6 + $0x1] ss:$0 sm:$0xff]  ;;  %s3750_s6 = sshll.u32 %s5750_s20, 4  ;;  %s3751_s6 = int_to_ptr.vmem [resolvable:$true] %s3750_s6 }
 0x7d6   :  { %v3661_v38 = vadd.f32 1e-05, %v3660_v37 }
 0x7d8   :  { %5721 = vrsqrt.f32 %v3661_v38  ;;  %vm3668_vm12 = vweird.f32 %v3661_v38 }
 0x7de   :  { %v5722_v13 = vpop.eup %5721 }
 0x7df   :  { %v3663_v39 = vmul.f32 %v5722_v13, %v3661_v38  ;;  %vm3669_vm11 = vweird.f32 %v5722_v13 }
 0x7e0   :  { %vm3670_vm13 = vmor %vm3668_vm12, %vm3669_vm11 }
 0x7e1   :  { %v3664_v40 = vmul.f32 %v5722_v13, %v3663_v39 }
 0x7e3   :  { %v3665_v41 = vmul.f32 0.5, %v3664_v40 }
 0x7e5   :  { %v3666_v42 = vsub.f32 1.5, %v3665_v41 }
 0x7e7   :  { %v3667_v43 = vmul.f32 %v5722_v13, %v3666_v42 }
 0x7e9   :  { %v3671_v44 = vsel %vm3670_vm13, %v5722_v13, %v3667_v43 }
 0x7ea   :  { %v3672_v45 = vmul.f32 %v3671_v44, %v3655_v28 }
 0x7ec   :  { %v3676_v46 = vmul.f32 %v5709_v26, %v3672_v45 }
 0x7ee   :  { %v3680_v47 = vadd.f32 %v5710_v16, %v3676_v46 }
 0x7f0   :  { %5375 = vmatmul.msk.f32.vlgmr.msra.gmra.mxu2 %vm61_vm0, %v3680_v47 }
 0x873   :  { %v3709_v49 = vpop.f32.mrf.mxu2 }
 0x874   :  { %v3710_v50 = vadd.f32 %v5711_v48, %v3709_v49 }
 0x876   :  { %v3712_v51 = vmax.f32 %v3710_v50, 0.0 }
 0x878   :  { %5376 = vmatmul.msk.f32.vlgmr.msra.gmra.mxu3 %vm3719_vm14, %v3712_v51 }
 0x8fb   :  { %v3740_v53 = vpop.f32.mrf.mxu3 }
 0x8fc   :  { %v3741_v54 = vadd.f32 %v5712_v52, %v3740_v53 }
 0x8fe   :  { %3744 = vst.msk [vmem:[#allocation2] sm:$0xff] %vm3743_vm15, %v3741_v54 }
 0x8ff   :  { %3755 = dma.vmem_to_hbm [thread:$0]  %s3751_s6, 128, %s3753_s22, [#allocation3]  }
 0x900   :  { %5747 = dma.done.wait [#allocation3], 128  }
 0x901   :  { %5748 = vsyncadd [#allocation3], 4294967168 }
 0x902   :  { %3760 = vsyncpa [#allocation3], 1 }

</bundles_post_ra>
